<compile_context>
chip_gen: v5e
topology: v5e:2x2
jax: 0.10.0
libtpu: 0.0.40
codegen_flags: <defaults>
</compile_context>

<pallas_src>
import jax
import jax.numpy as jnp
import numpy as np
from jax.experimental import pallas as pl
from jax.experimental.pallas import tpu as pltpu


def _decoder_kernel(y_emb_ref, tgt_ref, ctx_ref,
                    w_init_ref, b_init_ref,
                    w_ih_ref, b_gi_ref,
                    w_hh_ref, b_gh_ref,
                    w_ho_ref, b_ho_ref, w_op_ref, b_op_ref,
                    logp_ref, loss_ref,
                    h_all_ref, gi_ref):
    i = pl.program_id(0)
    R, H3 = gi_ref.shape            # R = (T-1) * B, H3 = 3 * H
    H = h_all_ref.shape[1]
    B = ctx_ref.shape[0]
    TR, V = logp_ref.shape          # phase-3 row tile
    n_steps = R // B

    # ---- Grid step 0: Phase 1 (fused input projection) + Phase 2 (GRU) -----
    @pl.when(i == 0)
    def _phases_1_2():
        # One (R, D) @ (D, 3H) MXU pass; b_ih + b_hr/b_hz already folded into
        # b_gi by the wrapper.
        x = y_emb_ref[...]                                          # (R, D)
        gi_ref[...] = (jnp.dot(x, w_ih_ref[...],
                               preferred_element_type=jnp.float32)
                       + b_gi_ref[...])

        # f_init: h0 = tanh(ctx @ W_init + b_init)   (FF with activ='tanh')
        h0 = jnp.tanh(jnp.dot(ctx_ref[...], w_init_ref[...],
                              preferred_element_type=jnp.float32)
                      + b_init_ref[...])

        # Hoist loop-invariant recurrent weight and the (only) in-loop bias,
        # pre-broadcast once so unrolled iterations don't re-emit broadcasts.
        whh = w_hh_ref[...]                                         # (H, 3H)
        bgh = jnp.broadcast_to(b_gh_ref[...], (B, H3))              # [0,0,b_hn]

        # Sequential GRU recurrence (PyTorch gate order r, z, n): one fused
        # h @ W_hh push per step, gates split with static lane slices.
        def step(t, h):
            row = pl.multiple_of(t * B, B)
            gi = gi_ref[pl.ds(row, B), :]                           # (B, 3H)
            gh = jnp.dot(h, whh, preferred_element_type=jnp.float32) + bgh
            r = jax.nn.sigmoid(gi[:, :H] + gh[:, :H])
            z = jax.nn.sigmoid(gi[:, H:2 * H] + gh[:, H:2 * H])
            n = jnp.tanh(gi[:, 2 * H:] + r * gh[:, 2 * H:])
            h1 = (1.0 - z) * n + z * h
            h_all_ref[pl.ds(row, B), :] = h1
            return h1

        jax.lax.fori_loop(0, n_steps, step, h0, unroll=min(n_steps, 8))

        loss_ref[...] = jnp.zeros_like(loss_ref)

    # ---- Phase 3: output head on this grid step's row tile -----------------
    row = pl.multiple_of(i * TR, TR)
    h_t = h_all_ref[pl.ds(row, TR), :]                              # (TR, H)

    # hid2out: tanh(FF) with zero-initialized bias (bias_zero=True)
    w_ho = w_ho_ref[...]
    h3 = jnp.tanh(jnp.dot(h_t.astype(w_ho.dtype), w_ho,
                          preferred_element_type=jnp.float32) + b_ho_ref[...])
    # out2prob (plain linear) + stable log_softmax
    w_op = w_op_ref[...]
    logits = jnp.dot(h3.astype(w_op.dtype), w_op,
                     preferred_element_type=jnp.float32) + b_op_ref[...]
    m = jnp.max(logits, axis=-1, keepdims=True)
    shifted = logits - m
    lse = jnp.log(jnp.sum(jnp.exp(shifted), axis=-1, keepdims=True))
    logp = shifted - lse
    logp_ref[...] = logp                                            # lane-dense

    # NLLLoss(reduction='sum', ignore_index=0) against y[t+1]: pick straight
    # from the logp tile with a select (no materialized one-hot).
    tgt = tgt_ref[pl.ds(row, TR), :]                                # (TR, 1)
    vocab_ids = jax.lax.broadcasted_iota(jnp.int32, (TR, V), 1)
    picked = jnp.sum(jnp.where(vocab_ids == tgt, logp, 0.0),
                     axis=-1, keepdims=True)                        # (TR, 1)
    partial = -jnp.sum(jnp.where(tgt != 0, picked, 0.0))
    loss_ref[...] = loss_ref[...] + partial                         # resident accum


def vector_decoder_forward(y, ctx, p, *, matmul_dtype=jnp.float32,
                           max_rows_per_tile=64):
    """Eval-mode forward of VectorDecoder. Returns {'loss', 'logps'}."""
    T, B = y.shape
    V, D = p["emb"].shape
    C = ctx.shape[1]
    H = p["w_hh"].shape[0]
    H3 = 3 * H
    n_steps = T - 1
    R = n_steps * B
    assert B % 8 == 0, "batch must be a multiple of 8 (sublane alignment)"

    # Embedding lookup (gather over vocab) kept as JAX glue for now.
    y_emb_flat = p["emb"][y[:n_steps]].reshape(R, D).astype(matmul_dtype)
    tgt = y[1:].astype(jnp.int32).reshape(R, 1)                 # y[t+1] targets

    # Fold the recurrent r/z biases into the input-projection bias; b_hn stays
    # separate (it sits inside the r * (...) term of the GRU).
    b_ih, b_hh = p["b_ih"], p["b_hh"]
    zeros_h = jnp.zeros((1, H), jnp.float32)
    b_gi = b_ih + jnp.concatenate([b_hh[:, :H], b_hh[:, H:2 * H], zeros_h], 1)
    b_gh = jnp.concatenate([zeros_h, zeros_h, b_hh[:, 2 * H:]], axis=1)

    # Optional reduced-precision matmul operands for the batched phases; the
    # recurrence weight stays f32.
    w_ih = p["w_ih"].astype(matmul_dtype)                       # (D, 3H)
    w_ho = p["w_ho"].astype(matmul_dtype)                       # (H, D)
    w_op = p["w_op"].astype(matmul_dtype)                       # (D, V)
    w_hh = p["w_hh"]                                            # (H, 3H), f32

    # Phase-3 row tile: largest timestep-divisor whose rows fit the target
    # (divisor requirement avoids ragged tiles / masked partial stores).
    steps_per_tile = 1
    for d in range(1, n_steps + 1):
        if n_steps % d == 0 and d * B <= max_rows_per_tile:
            steps_per_tile = d
    TR = steps_per_tile * B
    n_tiles = n_steps // steps_per_tile

    operands = (y_emb_flat, tgt, ctx, p["w_init"], p["b_init"],
                w_ih, b_gi, w_hh, b_gh, w_ho, p["b_ho"], w_op, p["b_op"])

    # Explicit VMEM budget: operands + pipelined output tiles (x2 buffering)
    # + scratch + headroom, clamped to the v7x 64 MiB physical limit.
    in_bytes = sum(int(np.prod(a.shape)) * a.dtype.itemsize for a in operands)
    out_bytes = TR * V * 4 + 4
    scratch_bytes = (R * H + R * H3) * 4
    vmem_limit = int(min(max(2 * (in_bytes + out_bytes) + scratch_bytes
                             + (4 << 20), 16 << 20), 64 << 20))

    def resident(shape):
        nd = len(shape)
        return pl.BlockSpec(shape, lambda i, _nd=nd: (0,) * _nd)

    in_specs = [
        resident((R, D)),                                       # y_emb (flat)
        resident((R, 1)),                                       # targets
        resident((B, C)),                                       # ctx
        resident((C, H)), resident((1, H)),                     # ff_dec_init
        resident((D, H3)), resident((1, H3)),                   # W_ih, b_gi
        resident((H, H3)), resident((1, H3)),                   # W_hh, b_gh
        resident((H, D)), resident((1, D)),                     # hid2out
        resident((D, V)), resident((1, V)),                     # out2prob
    ]
    out_specs = [
        pl.BlockSpec((TR, V), lambda i: (i, 0)),                # logps row tile
        pl.BlockSpec((1, 1), lambda i: (0, 0)),                 # summed loss
    ]

    logp_flat, loss = pl.pallas_call(
        _decoder_kernel,
        out_shape=(jax.ShapeDtypeStruct((R, V), jnp.float32),
                   jax.ShapeDtypeStruct((1, 1), jnp.float32)),
        grid_spec=pltpu.PrefetchScalarGridSpec(
            num_scalar_prefetch=0,
            grid=(n_tiles,),
            in_specs=in_specs,
            out_specs=out_specs,
            scratch_shapes=[pltpu.VMEM((R, H), jnp.float32),    # h_all
                            pltpu.VMEM((R, H3), jnp.float32)]), # fused gi
        compiler_params=pltpu.CompilerParams(
            dimension_semantics=("arbitrary",),
            vmem_limit_bytes=vmem_limit),
    )(*operands)

    return {"loss": loss[0, 0], "logps": logp_flat.reshape(n_steps, B, V)}


def reference_forward(y, ctx, p):
    """Pure-JAX reference (mirrors the PyTorch forward, eval mode)."""
    T, B = y.shape
    H = p["w_hh"].shape[0]
    y_emb = p["emb"][y]
    h = jnp.tanh(ctx @ p["w_init"] + p["b_init"])
    loss = 0.0
    logps = []
    for t in range(T - 1):
        x = y_emb[t]
        gi = x @ p["w_ih"] + p["b_ih"]
        gh = h @ p["w_hh"] + p["b_hh"]
        r = jax.nn.sigmoid(gi[:, :H] + gh[:, :H])
        z = jax.nn.sigmoid(gi[:, H:2 * H] + gh[:, H:2 * H])
        n = jnp.tanh(gi[:, 2 * H:] + r * gh[:, 2 * H:])
        h = (1.0 - z) * n + z * h
        h3 = jnp.tanh(h @ p["w_ho"] + p["b_ho"])
        log_p = jax.nn.log_softmax(h3 @ p["w_op"] + p["b_op"], axis=-1)
        logps.append(log_p)
        tgt = y[t + 1]
        picked = jnp.take_along_axis(log_p, tgt[:, None], axis=1)[:, 0]
        loss = loss + (-jnp.sum(jnp.where(tgt != 0, picked, 0.0)))
    return loss, jnp.stack(logps)


if __name__ == "__main__":
    # Small, module-consistent shapes.
    T, B = 9, 8                 # sequence length, batch (n_steps = 8)
    D = 32                      # input_size (embedding dim)
    H = 32                      # hidden_size
    C = 32                      # ctx_size_dict[ctx_name]
    V = 128                     # n_vocab

    key = jax.random.PRNGKey(0)
    ks = jax.random.split(key, 12)

    def init(k, shape, scale=0.1):
        return (scale * jax.random.normal(k, shape)).astype(jnp.float32)

    emb = init(ks[0], (V, D))
    emb = emb.at[0].set(0.0)                 # padding_idx=0 -> zero row

    p = {
        "emb": emb,
        # FF(ctx_size, hidden, activ='tanh')
        "w_init": init(ks[1], (H, C)).T, "b_init": init(ks[2], (1, H)),
        # nn.GRUCell(input_size, hidden_size)   (PyTorch r|z|n gate order)
        "w_ih": init(ks[3], (3 * H, D)).T, "b_ih": init(ks[4], (1, 3 * H)),
        "w_hh": init(ks[5], (3 * H, H)).T, "b_hh": init(ks[6], (1, 3 * H)),
        # FF(hidden, input, bias_zero=True, activ='tanh')
        "w_ho": init(ks[7], (D, H)).T, "b_ho": jnp.zeros((1, D), jnp.float32),
        # FF(input, n_vocab)  (not tied)
        "w_op": init(ks[8], (V, D)).T, "b_op": init(ks[9], (1, V)),
    }

    y = jax.random.randint(ks[10], (T, B), 0, V, dtype=jnp.int32)
    # inject some padding tokens to exercise ignore_index=0
    y = y.at[3, 1].set(0).at[5, 4].set(0).at[8, 0].set(0)
    ctx = init(ks[11], (B, C), scale=1.0)

    # max_rows_per_tile=32 -> 4 timesteps per phase-3 tile -> grid=(2,), which
    # exercises the tiled output head + resident loss accumulation path.
    out = vector_decoder_forward(y, ctx, p, max_rows_per_tile=32)
    jax.block_until_ready(out["loss"])
    jax.block_until_ready(out["logps"])

    ref_loss, ref_logps = reference_forward(y, ctx, p)
    np.testing.assert_allclose(np.array(out["logps"]), np.array(ref_logps),
                               rtol=1e-4, atol=1e-4)
    np.testing.assert_allclose(np.array(out["loss"]), np.array(ref_loss),
                               rtol=1e-3, atol=1e-3)

    print("KERNEL_OK")
</pallas_src>

<mosaic_0001>
module attributes {stable_mosaic.version = 11 : i64} {
  func.func @_decoder_kernel(%arg0: i32, %arg1: memref<64x32xf32, #tpu.memory_space<vmem>>, %arg2: memref<64x1xi32, #tpu.memory_space<vmem>>, %arg3: memref<8x32xf32, #tpu.memory_space<vmem>>, %arg4: memref<32x32xf32, #tpu.memory_space<vmem>>, %arg5: memref<1x32xf32, #tpu.memory_space<vmem>>, %arg6: memref<32x96xf32, #tpu.memory_space<vmem>>, %arg7: memref<1x96xf32, #tpu.memory_space<vmem>>, %arg8: memref<32x96xf32, #tpu.memory_space<vmem>>, %arg9: memref<1x96xf32, #tpu.memory_space<vmem>>, %arg10: memref<32x32xf32, #tpu.memory_space<vmem>>, %arg11: memref<1x32xf32, #tpu.memory_space<vmem>>, %arg12: memref<32x128xf32, #tpu.memory_space<vmem>>, %arg13: memref<1x128xf32, #tpu.memory_space<vmem>>, %arg14: memref<32x128xf32, #tpu.memory_space<vmem>>, %arg15: memref<1x1xf32, #tpu.memory_space<vmem>>, %arg16: memref<64x32xf32, #tpu.memory_space<vmem>>, %arg17: memref<64x96xf32, #tpu.memory_space<vmem>>) attributes {dimension_semantics = [#tpu.dimension_semantics<arbitrary>], iteration_bounds = array<i64: 2>, scalar_prefetch = 0 : i64, scratch_operands = 2 : i64, tpu.core_type = #tpu.core_type<tc>, window_params = [{pipeline_mode = #tpu.pipeline_mode<synchronous>, transform_indices = @transform_0, window_bounds = array<i64: 64, 32>}, {pipeline_mode = #tpu.pipeline_mode<synchronous>, transform_indices = @transform_1, window_bounds = array<i64: 64, 1>}, {pipeline_mode = #tpu.pipeline_mode<synchronous>, transform_indices = @transform_2, window_bounds = array<i64: 8, 32>}, {pipeline_mode = #tpu.pipeline_mode<synchronous>, transform_indices = @transform_3, window_bounds = array<i64: 32, 32>}, {pipeline_mode = #tpu.pipeline_mode<synchronous>, transform_indices = @transform_4, window_bounds = array<i64: 1, 32>}, {pipeline_mode = #tpu.pipeline_mode<synchronous>, transform_indices = @transform_5, window_bounds = array<i64: 32, 96>}, {pipeline_mode = #tpu.pipeline_mode<synchronous>, transform_indices = @transform_6, window_bounds = array<i64: 1, 96>}, {pipeline_mode = #tpu.pipeline_mode<synchronous>, transform_indices = @transform_7, window_bounds = array<i64: 32, 96>}, {pipeline_mode = #tpu.pipeline_mode<synchronous>, transform_indices = @transform_8, window_bounds = array<i64: 1, 96>}, {pipeline_mode = #tpu.pipeline_mode<synchronous>, transform_indices = @transform_9, window_bounds = array<i64: 32, 32>}, {pipeline_mode = #tpu.pipeline_mode<synchronous>, transform_indices = @transform_10, window_bounds = array<i64: 1, 32>}, {pipeline_mode = #tpu.pipeline_mode<synchronous>, transform_indices = @transform_11, window_bounds = array<i64: 32, 128>}, {pipeline_mode = #tpu.pipeline_mode<synchronous>, transform_indices = @transform_12, window_bounds = array<i64: 1, 128>}, {transform_indices = @transform_13, window_bounds = array<i64: 32, 128>}, {pipeline_mode = #tpu.pipeline_mode<synchronous>, transform_indices = @transform_14, window_bounds = array<i64: 1, 1>}]} {
    %c0_i32 = arith.constant 0 : i32
    %0 = arith.cmpi eq, %arg0, %c0_i32 : i32
    %1 = arith.extui %0 : i1 to i32
    %c0_i32_0 = arith.constant 0 : i32
    %2 = arith.cmpi ne, %1, %c0_i32_0 : i32
    scf.if %2 {
      %c0_25 = arith.constant 0 : index
      %c0_26 = arith.constant 0 : index
      %51 = vector.load %arg1[%c0_25, %c0_26] : memref<64x32xf32, #tpu.memory_space<vmem>>, vector<64x32xf32>
      %c0_27 = arith.constant 0 : index
      %c0_28 = arith.constant 0 : index
      %52 = vector.load %arg6[%c0_27, %c0_28] : memref<32x96xf32, #tpu.memory_space<vmem>>, vector<32x96xf32>
      %cst_29 = arith.constant dense<0.000000e+00> : vector<64x96xf32>
      %53 = tpu.matmul %51, %52, %cst_29 {dimension_numbers = #tpu.dot_dimension_numbers<[1], [0], [0], [1], [0, 0, 1, 1], [], []>} : vector<64x32xf32>, vector<32x96xf32>, vector<64x96xf32> -> vector<64x96xf32>
      %c0_30 = arith.constant 0 : index
      %c0_31 = arith.constant 0 : index
      %54 = vector.load %arg7[%c0_30, %c0_31] : memref<1x96xf32, #tpu.memory_space<vmem>>, vector<1x96xf32>
      %55 = vector.broadcast %54 : vector<1x96xf32> to vector<64x96xf32>
      %56 = arith.addf %53, %55 : vector<64x96xf32>
      %c0_32 = arith.constant 0 : index
      %c0_33 = arith.constant 0 : index
      %57 = vector.load %arg17[%c0_32, %c0_33] : memref<64x96xf32, #tpu.memory_space<vmem>>, vector<64x96xf32>
      tpu.vector_store %arg17[%c0_32, %c0_33], %56 {strides = array<i32>} : memref<64x96xf32, #tpu.memory_space<vmem>>, vector<64x96xf32>,
      %c0_34 = arith.constant 0 : index
      %c0_35 = arith.constant 0 : index
      %58 = vector.load %arg3[%c0_34, %c0_35] : memref<8x32xf32, #tpu.memory_space<vmem>>, vector<8x32xf32>
      %c0_36 = arith.constant 0 : index
      %c0_37 = arith.constant 0 : index
      %59 = vector.load %arg4[%c0_36, %c0_37] : memref<32x32xf32, #tpu.memory_space<vmem>>, vector<32x32xf32>
      %cst_38 = arith.constant dense<0.000000e+00> : vector<8x32xf32>
      %60 = tpu.matmul %58, %59, %cst_38 {dimension_numbers = #tpu.dot_dimension_numbers<[1], [0], [0], [1], [0, 0, 1, 1], [], []>} : vector<8x32xf32>, vector<32x32xf32>, vector<8x32xf32> -> vector<8x32xf32>
      %c0_39 = arith.constant 0 : index
      %c0_40 = arith.constant 0 : index
      %61 = vector.load %arg5[%c0_39, %c0_40] : memref<1x32xf32, #tpu.memory_space<vmem>>, vector<1x32xf32>
      %62 = vector.broadcast %61 : vector<1x32xf32> to vector<8x32xf32>
      %63 = arith.addf %60, %62 : vector<8x32xf32>
      %64 = math.tanh %63 : vector<8x32xf32>
      %c0_41 = arith.constant 0 : index
      %c0_42 = arith.constant 0 : index
      %65 = vector.load %arg8[%c0_41, %c0_42] : memref<32x96xf32, #tpu.memory_space<vmem>>, vector<32x96xf32>
      %c0_43 = arith.constant 0 : index
      %c0_44 = arith.constant 0 : index
      %66 = vector.load %arg9[%c0_43, %c0_44] : memref<1x96xf32, #tpu.memory_space<vmem>>, vector<1x96xf32>
      %67 = vector.shape_cast %66 : vector<1x96xf32> to vector<1x96xf32>
      %68 = vector.broadcast %67 : vector<1x96xf32> to vector<8x96xf32>
      %c0_i32_45 = arith.constant 0 : i32
      %c8_i32 = arith.constant 8 : i32
      %69 = arith.muli %c0_i32_45, %c8_i32 : i32
      %70 = tpu.assume_multiple %69, 8 : i32
      %71 = arith.index_cast %70 : i32 to index
      %c0_46 = arith.constant 0 : index
      %72 = vector.load %arg17[%71, %c0_46] : memref<64x96xf32, #tpu.memory_space<vmem>>, vector<8x96xf32>
      %cst_47 = arith.constant dense<0.000000e+00> : vector<8x96xf32>
      %73 = tpu.matmul %64, %65, %cst_47 {dimension_numbers = #tpu.dot_dimension_numbers<[1], [0], [0], [1], [0, 0, 1, 1], [], []>} : vector<8x32xf32>, vector<32x96xf32>, vector<8x96xf32> -> vector<8x96xf32>
      %74 = arith.addf %73, %68 : vector<8x96xf32>
      %75 = vector.extract_strided_slice %72 {offsets = [0, 0], sizes = [8, 32], strides = [1, 1]} : vector<8x96xf32> to vector<8x32xf32>
      %76 = vector.extract_strided_slice %74 {offsets = [0, 0], sizes = [8, 32], strides = [1, 1]} : vector<8x96xf32> to vector<8x32xf32>
      %77 = arith.addf %75, %76 : vector<8x32xf32>
      %78 = arith.negf %77 : vector<8x32xf32>
      %79 = math.exp %78 : vector<8x32xf32>
      %cst_48 = arith.constant 1.000000e+00 : f32
      %80 = vector.broadcast %cst_48 : f32 to vector<8x32xf32>
      %81 = arith.addf %80, %79 : vector<8x32xf32>
      %82 = arith.divf %80, %81 : vector<8x32xf32>
      %83 = vector.extract_strided_slice %72 {offsets = [0, 32], sizes = [8, 32], strides = [1, 1]} : vector<8x96xf32> to vector<8x32xf32>
      %84 = vector.extract_strided_slice %74 {offsets = [0, 32], sizes = [8, 32], strides = [1, 1]} : vector<8x96xf32> to vector<8x32xf32>
      %85 = arith.addf %83, %84 : vector<8x32xf32>
      %86 = arith.negf %85 : vector<8x32xf32>
      %87 = math.exp %86 : vector<8x32xf32>
      %cst_49 = arith.constant 1.000000e+00 : f32
      %88 = vector.broadcast %cst_49 : f32 to vector<8x32xf32>
      %89 = arith.addf %88, %87 : vector<8x32xf32>
      %90 = arith.divf %88, %89 : vector<8x32xf32>
      %91 = vector.extract_strided_slice %72 {offsets = [0, 64], sizes = [8, 32], strides = [1, 1]} : vector<8x96xf32> to vector<8x32xf32>
      %92 = vector.extract_strided_slice %74 {offsets = [0, 64], sizes = [8, 32], strides = [1, 1]} : vector<8x96xf32> to vector<8x32xf32>
      %93 = arith.mulf %82, %92 : vector<8x32xf32>
      %94 = arith.addf %91, %93 : vector<8x32xf32>
      %95 = math.tanh %94 : vector<8x32xf32>
      %cst_50 = arith.constant 1.000000e+00 : f32
      %96 = vector.broadcast %cst_50 : f32 to vector<8x32xf32>
      %97 = arith.subf %96, %90 : vector<8x32xf32>
      %98 = arith.mulf %97, %95 : vector<8x32xf32>
      %99 = arith.mulf %90, %64 : vector<8x32xf32>
      %100 = arith.addf %98, %99 : vector<8x32xf32>
      %101 = arith.index_cast %70 : i32 to index
      %c0_51 = arith.constant 0 : index
      %102 = vector.load %arg16[%101, %c0_51] : memref<64x32xf32, #tpu.memory_space<vmem>>, vector<8x32xf32>
      tpu.vector_store %arg16[%101, %c0_51], %100 {strides = array<i32>} : memref<64x32xf32, #tpu.memory_space<vmem>>, vector<8x32xf32>,
      %c1_i32 = arith.constant 1 : i32
      %c8_i32_52 = arith.constant 8 : i32
      %103 = arith.muli %c1_i32, %c8_i32_52 : i32
      %104 = tpu.assume_multiple %103, 8 : i32
      %105 = arith.index_cast %104 : i32 to index
      %c0_53 = arith.constant 0 : index
      %106 = vector.load %arg17[%105, %c0_53] : memref<64x96xf32, #tpu.memory_space<vmem>>, vector<8x96xf32>
      %cst_54 = arith.constant dense<0.000000e+00> : vector<8x96xf32>
      %107 = tpu.matmul %100, %65, %cst_54 {dimension_numbers = #tpu.dot_dimension_numbers<[1], [0], [0], [1], [0, 0, 1, 1], [], []>} : vector<8x32xf32>, vector<32x96xf32>, vector<8x96xf32> -> vector<8x96xf32>
      %108 = arith.addf %107, %68 : vector<8x96xf32>
      %109 = vector.extract_strided_slice %106 {offsets = [0, 0], sizes = [8, 32], strides = [1, 1]} : vector<8x96xf32> to vector<8x32xf32>
      %110 = vector.extract_strided_slice %108 {offsets = [0, 0], sizes = [8, 32], strides = [1, 1]} : vector<8x96xf32> to vector<8x32xf32>
      %111 = arith.addf %109, %110 : vector<8x32xf32>
      %112 = arith.negf %111 : vector<8x32xf32>
      %113 = math.exp %112 : vector<8x32xf32>
      %cst_55 = arith.constant 1.000000e+00 : f32
      %114 = vector.broadcast %cst_55 : f32 to vector<8x32xf32>
      %115 = arith.addf %114, %113 : vector<8x32xf32>
      %116 = arith.divf %114, %115 : vector<8x32xf32>
      %117 = vector.extract_strided_slice %106 {offsets = [0, 32], sizes = [8, 32], strides = [1, 1]} : vector<8x96xf32> to vector<8x32xf32>
      %118 = vector.extract_strided_slice %108 {offsets = [0, 32], sizes = [8, 32], strides = [1, 1]} : vector<8x96xf32> to vector<8x32xf32>
      %119 = arith.addf %117, %118 : vector<8x32xf32>
      %120 = arith.negf %119 : vector<8x32xf32>
      %121 = math.exp %120 : vector<8x32xf32>
      %cst_56 = arith.constant 1.000000e+00 : f32
      %122 = vector.broadcast %cst_56 : f32 to vector<8x32xf32>
      %123 = arith.addf %122, %121 : vector<8x32xf32>
      %124 = arith.divf %122, %123 : vector<8x32xf32>
      %125 = vector.extract_strided_slice %106 {offsets = [0, 64], sizes = [8, 32], strides = [1, 1]} : vector<8x96xf32> to vector<8x32xf32>
      %126 = vector.extract_strided_slice %108 {offsets = [0, 64], sizes = [8, 32], strides = [1, 1]} : vector<8x96xf32> to vector<8x32xf32>
      %127 = arith.mulf %116, %126 : vector<8x32xf32>
      %128 = arith.addf %125, %127 : vector<8x32xf32>
      %129 = math.tanh %128 : vector<8x32xf32>
      %cst_57 = arith.constant 1.000000e+00 : f32
      %130 = vector.broadcast %cst_57 : f32 to vector<8x32xf32>
      %131 = arith.subf %130, %124 : vector<8x32xf32>
      %132 = arith.mulf %131, %129 : vector<8x32xf32>
      %133 = arith.mulf %124, %100 : vector<8x32xf32>
      %134 = arith.addf %132, %133 : vector<8x32xf32>
      %135 = arith.index_cast %104 : i32 to index
      %c0_58 = arith.constant 0 : index
      %136 = vector.load %arg16[%135, %c0_58] : memref<64x32xf32, #tpu.memory_space<vmem>>, vector<8x32xf32>
      tpu.vector_store %arg16[%135, %c0_58], %134 {strides = array<i32>} : memref<64x32xf32, #tpu.memory_space<vmem>>, vector<8x32xf32>,
      %c2_i32 = arith.constant 2 : i32
      %c8_i32_59 = arith.constant 8 : i32
      %137 = arith.muli %c2_i32, %c8_i32_59 : i32
      %138 = tpu.assume_multiple %137, 8 : i32
      %139 = arith.index_cast %138 : i32 to index
      %c0_60 = arith.constant 0 : index
      %140 = vector.load %arg17[%139, %c0_60] : memref<64x96xf32, #tpu.memory_space<vmem>>, vector<8x96xf32>
      %cst_61 = arith.constant dense<0.000000e+00> : vector<8x96xf32>
      %141 = tpu.matmul %134, %65, %cst_61 {dimension_numbers = #tpu.dot_dimension_numbers<[1], [0], [0], [1], [0, 0, 1, 1], [], []>} : vector<8x32xf32>, vector<32x96xf32>, vector<8x96xf32> -> vector<8x96xf32>
      %142 = arith.addf %141, %68 : vector<8x96xf32>
      %143 = vector.extract_strided_slice %140 {offsets = [0, 0], sizes = [8, 32], strides = [1, 1]} : vector<8x96xf32> to vector<8x32xf32>
      %144 = vector.extract_strided_slice %142 {offsets = [0, 0], sizes = [8, 32], strides = [1, 1]} : vector<8x96xf32> to vector<8x32xf32>
      %145 = arith.addf %143, %144 : vector<8x32xf32>
      %146 = arith.negf %145 : vector<8x32xf32>
      %147 = math.exp %146 : vector<8x32xf32>
      %cst_62 = arith.constant 1.000000e+00 : f32
      %148 = vector.broadcast %cst_62 : f32 to vector<8x32xf32>
      %149 = arith.addf %148, %147 : vector<8x32xf32>
      %150 = arith.divf %148, %149 : vector<8x32xf32>
      %151 = vector.extract_strided_slice %140 {offsets = [0, 32], sizes = [8, 32], strides = [1, 1]} : vector<8x96xf32> to vector<8x32xf32>
      %152 = vector.extract_strided_slice %142 {offsets = [0, 32], sizes = [8, 32], strides = [1, 1]} : vector<8x96xf32> to vector<8x32xf32>
      %153 = arith.addf %151, %152 : vector<8x32xf32>
      %154 = arith.negf %153 : vector<8x32xf32>
      %155 = math.exp %154 : vector<8x32xf32>
      %cst_63 = arith.constant 1.000000e+00 : f32
      %156 = vector.broadcast %cst_63 : f32 to vector<8x32xf32>
      %157 = arith.addf %156, %155 : vector<8x32xf32>
      %158 = arith.divf %156, %157 : vector<8x32xf32>
      %159 = vector.extract_strided_slice %140 {offsets = [0, 64], sizes = [8, 32], strides = [1, 1]} : vector<8x96xf32> to vector<8x32xf32>
      %160 = vector.extract_strided_slice %142 {offsets = [0, 64], sizes = [8, 32], strides = [1, 1]} : vector<8x96xf32> to vector<8x32xf32>
      %161 = arith.mulf %150, %160 : vector<8x32xf32>
      %162 = arith.addf %159, %161 : vector<8x32xf32>
      %163 = math.tanh %162 : vector<8x32xf32>
      %cst_64 = arith.constant 1.000000e+00 : f32
      %164 = vector.broadcast %cst_64 : f32 to vector<8x32xf32>
      %165 = arith.subf %164, %158 : vector<8x32xf32>
      %166 = arith.mulf %165, %163 : vector<8x32xf32>
      %167 = arith.mulf %158, %134 : vector<8x32xf32>
      %168 = arith.addf %166, %167 : vector<8x32xf32>
      %169 = arith.index_cast %138 : i32 to index
      %c0_65 = arith.constant 0 : index
      %170 = vector.load %arg16[%169, %c0_65] : memref<64x32xf32, #tpu.memory_space<vmem>>, vector<8x32xf32>
      tpu.vector_store %arg16[%169, %c0_65], %168 {strides = array<i32>} : memref<64x32xf32, #tpu.memory_space<vmem>>, vector<8x32xf32>,
      %c3_i32 = arith.constant 3 : i32
      %c8_i32_66 = arith.constant 8 : i32
      %171 = arith.muli %c3_i32, %c8_i32_66 : i32
      %172 = tpu.assume_multiple %171, 8 : i32
      %173 = arith.index_cast %172 : i32 to index
      %c0_67 = arith.constant 0 : index
      %174 = vector.load %arg17[%173, %c0_67] : memref<64x96xf32, #tpu.memory_space<vmem>>, vector<8x96xf32>
      %cst_68 = arith.constant dense<0.000000e+00> : vector<8x96xf32>
      %175 = tpu.matmul %168, %65, %cst_68 {dimension_numbers = #tpu.dot_dimension_numbers<[1], [0], [0], [1], [0, 0, 1, 1], [], []>} : vector<8x32xf32>, vector<32x96xf32>, vector<8x96xf32> -> vector<8x96xf32>
      %176 = arith.addf %175, %68 : vector<8x96xf32>
      %177 = vector.extract_strided_slice %174 {offsets = [0, 0], sizes = [8, 32], strides = [1, 1]} : vector<8x96xf32> to vector<8x32xf32>
      %178 = vector.extract_strided_slice %176 {offsets = [0, 0], sizes = [8, 32], strides = [1, 1]} : vector<8x96xf32> to vector<8x32xf32>
      %179 = arith.addf %177, %178 : vector<8x32xf32>
      %180 = arith.negf %179 : vector<8x32xf32>
      %181 = math.exp %180 : vector<8x32xf32>
      %cst_69 = arith.constant 1.000000e+00 : f32
      %182 = vector.broadcast %cst_69 : f32 to vector<8x32xf32>
      %183 = arith.addf %182, %181 : vector<8x32xf32>
      %184 = arith.divf %182, %183 : vector<8x32xf32>
      %185 = vector.extract_strided_slice %174 {offsets = [0, 32], sizes = [8, 32], strides = [1, 1]} : vector<8x96xf32> to vector<8x32xf32>
      %186 = vector.extract_strided_slice %176 {offsets = [0, 32], sizes = [8, 32], strides = [1, 1]} : vector<8x96xf32> to vector<8x32xf32>
      %187 = arith.addf %185, %186 : vector<8x32xf32>
      %188 = arith.negf %187 : vector<8x32xf32>
      %189 = math.exp %188 : vector<8x32xf32>
      %cst_70 = arith.constant 1.000000e+00 : f32
      %190 = vector.broadcast %cst_70 : f32 to vector<8x32xf32>
      %191 = arith.addf %190, %189 : vector<8x32xf32>
      %192 = arith.divf %190, %191 : vector<8x32xf32>
      %193 = vector.extract_strided_slice %174 {offsets = [0, 64], sizes = [8, 32], strides = [1, 1]} : vector<8x96xf32> to vector<8x32xf32>
      %194 = vector.extract_strided_slice %176 {offsets = [0, 64], sizes = [8, 32], strides = [1, 1]} : vector<8x96xf32> to vector<8x32xf32>
      %195 = arith.mulf %184, %194 : vector<8x32xf32>
      %196 = arith.addf %193, %195 : vector<8x32xf32>
      %197 = math.tanh %196 : vector<8x32xf32>
      %cst_71 = arith.constant 1.000000e+00 : f32
      %198 = vector.broadcast %cst_71 : f32 to vector<8x32xf32>
      %199 = arith.subf %198, %192 : vector<8x32xf32>
      %200 = arith.mulf %199, %197 : vector<8x32xf32>
      %201 = arith.mulf %192, %168 : vector<8x32xf32>
      %202 = arith.addf %200, %201 : vector<8x32xf32>
      %203 = arith.index_cast %172 : i32 to index
      %c0_72 = arith.constant 0 : index
      %204 = vector.load %arg16[%203, %c0_72] : memref<64x32xf32, #tpu.memory_space<vmem>>, vector<8x32xf32>
      tpu.vector_store %arg16[%203, %c0_72], %202 {strides = array<i32>} : memref<64x32xf32, #tpu.memory_space<vmem>>, vector<8x32xf32>,
      %c4_i32 = arith.constant 4 : i32
      %c8_i32_73 = arith.constant 8 : i32
      %205 = arith.muli %c4_i32, %c8_i32_73 : i32
      %206 = tpu.assume_multiple %205, 8 : i32
      %207 = arith.index_cast %206 : i32 to index
      %c0_74 = arith.constant 0 : index
      %208 = vector.load %arg17[%207, %c0_74] : memref<64x96xf32, #tpu.memory_space<vmem>>, vector<8x96xf32>
      %cst_75 = arith.constant dense<0.000000e+00> : vector<8x96xf32>
      %209 = tpu.matmul %202, %65, %cst_75 {dimension_numbers = #tpu.dot_dimension_numbers<[1], [0], [0], [1], [0, 0, 1, 1], [], []>} : vector<8x32xf32>, vector<32x96xf32>, vector<8x96xf32> -> vector<8x96xf32>
      %210 = arith.addf %209, %68 : vector<8x96xf32>
      %211 = vector.extract_strided_slice %208 {offsets = [0, 0], sizes = [8, 32], strides = [1, 1]} : vector<8x96xf32> to vector<8x32xf32>
      %212 = vector.extract_strided_slice %210 {offsets = [0, 0], sizes = [8, 32], strides = [1, 1]} : vector<8x96xf32> to vector<8x32xf32>
      %213 = arith.addf %211, %212 : vector<8x32xf32>
      %214 = arith.negf %213 : vector<8x32xf32>
      %215 = math.exp %214 : vector<8x32xf32>
      %cst_76 = arith.constant 1.000000e+00 : f32
      %216 = vector.broadcast %cst_76 : f32 to vector<8x32xf32>
      %217 = arith.addf %216, %215 : vector<8x32xf32>
      %218 = arith.divf %216, %217 : vector<8x32xf32>
      %219 = vector.extract_strided_slice %208 {offsets = [0, 32], sizes = [8, 32], strides = [1, 1]} : vector<8x96xf32> to vector<8x32xf32>
      %220 = vector.extract_strided_slice %210 {offsets = [0, 32], sizes = [8, 32], strides = [1, 1]} : vector<8x96xf32> to vector<8x32xf32>
      %221 = arith.addf %219, %220 : vector<8x32xf32>
      %222 = arith.negf %221 : vector<8x32xf32>
      %223 = math.exp %222 : vector<8x32xf32>
      %cst_77 = arith.constant 1.000000e+00 : f32
      %224 = vector.broadcast %cst_77 : f32 to vector<8x32xf32>
      %225 = arith.addf %224, %223 : vector<8x32xf32>
      %226 = arith.divf %224, %225 : vector<8x32xf32>
      %227 = vector.extract_strided_slice %208 {offsets = [0, 64], sizes = [8, 32], strides = [1, 1]} : vector<8x96xf32> to vector<8x32xf32>
      %228 = vector.extract_strided_slice %210 {offsets = [0, 64], sizes = [8, 32], strides = [1, 1]} : vector<8x96xf32> to vector<8x32xf32>
      %229 = arith.mulf %218, %228 : vector<8x32xf32>
      %230 = arith.addf %227, %229 : vector<8x32xf32>
      %231 = math.tanh %230 : vector<8x32xf32>
      %cst_78 = arith.constant 1.000000e+00 : f32
      %232 = vector.broadcast %cst_78 : f32 to vector<8x32xf32>
      %233 = arith.subf %232, %226 : vector<8x32xf32>
      %234 = arith.mulf %233, %231 : vector<8x32xf32>
      %235 = arith.mulf %226, %202 : vector<8x32xf32>
      %236 = arith.addf %234, %235 : vector<8x32xf32>
      %237 = arith.index_cast %206 : i32 to index
      %c0_79 = arith.constant 0 : index
      %238 = vector.load %arg16[%237, %c0_79] : memref<64x32xf32, #tpu.memory_space<vmem>>, vector<8x32xf32>
      tpu.vector_store %arg16[%237, %c0_79], %236 {strides = array<i32>} : memref<64x32xf32, #tpu.memory_space<vmem>>, vector<8x32xf32>,
      %c5_i32 = arith.constant 5 : i32
      %c8_i32_80 = arith.constant 8 : i32
      %239 = arith.muli %c5_i32, %c8_i32_80 : i32
      %240 = tpu.assume_multiple %239, 8 : i32
      %241 = arith.index_cast %240 : i32 to index
      %c0_81 = arith.constant 0 : index
      %242 = vector.load %arg17[%241, %c0_81] : memref<64x96xf32, #tpu.memory_space<vmem>>, vector<8x96xf32>
      %cst_82 = arith.constant dense<0.000000e+00> : vector<8x96xf32>
      %243 = tpu.matmul %236, %65, %cst_82 {dimension_numbers = #tpu.dot_dimension_numbers<[1], [0], [0], [1], [0, 0, 1, 1], [], []>} : vector<8x32xf32>, vector<32x96xf32>, vector<8x96xf32> -> vector<8x96xf32>
      %244 = arith.addf %243, %68 : vector<8x96xf32>
      %245 = vector.extract_strided_slice %242 {offsets = [0, 0], sizes = [8, 32], strides = [1, 1]} : vector<8x96xf32> to vector<8x32xf32>
      %246 = vector.extract_strided_slice %244 {offsets = [0, 0], sizes = [8, 32], strides = [1, 1]} : vector<8x96xf32> to vector<8x32xf32>
      %247 = arith.addf %245, %246 : vector<8x32xf32>
      %248 = arith.negf %247 : vector<8x32xf32>
      %249 = math.exp %248 : vector<8x32xf32>
      %cst_83 = arith.constant 1.000000e+00 : f32
      %250 = vector.broadcast %cst_83 : f32 to vector<8x32xf32>
      %251 = arith.addf %250, %249 : vector<8x32xf32>
      %252 = arith.divf %250, %251 : vector<8x32xf32>
      %253 = vector.extract_strided_slice %242 {offsets = [0, 32], sizes = [8, 32], strides = [1, 1]} : vector<8x96xf32> to vector<8x32xf32>
      %254 = vector.extract_strided_slice %244 {offsets = [0, 32], sizes = [8, 32], strides = [1, 1]} : vector<8x96xf32> to vector<8x32xf32>
      %255 = arith.addf %253, %254 : vector<8x32xf32>
      %256 = arith.negf %255 : vector<8x32xf32>
      %257 = math.exp %256 : vector<8x32xf32>
      %cst_84 = arith.constant 1.000000e+00 : f32
      %258 = vector.broadcast %cst_84 : f32 to vector<8x32xf32>
      %259 = arith.addf %258, %257 : vector<8x32xf32>
      %260 = arith.divf %258, %259 : vector<8x32xf32>
      %261 = vector.extract_strided_slice %242 {offsets = [0, 64], sizes = [8, 32], strides = [1, 1]} : vector<8x96xf32> to vector<8x32xf32>
      %262 = vector.extract_strided_slice %244 {offsets = [0, 64], sizes = [8, 32], strides = [1, 1]} : vector<8x96xf32> to vector<8x32xf32>
      %263 = arith.mulf %252, %262 : vector<8x32xf32>
      %264 = arith.addf %261, %263 : vector<8x32xf32>
      %265 = math.tanh %264 : vector<8x32xf32>
      %cst_85 = arith.constant 1.000000e+00 : f32
      %266 = vector.broadcast %cst_85 : f32 to vector<8x32xf32>
      %267 = arith.subf %266, %260 : vector<8x32xf32>
      %268 = arith.mulf %267, %265 : vector<8x32xf32>
      %269 = arith.mulf %260, %236 : vector<8x32xf32>
      %270 = arith.addf %268, %269 : vector<8x32xf32>
      %271 = arith.index_cast %240 : i32 to index
      %c0_86 = arith.constant 0 : index
      %272 = vector.load %arg16[%271, %c0_86] : memref<64x32xf32, #tpu.memory_space<vmem>>, vector<8x32xf32>
      tpu.vector_store %arg16[%271, %c0_86], %270 {strides = array<i32>} : memref<64x32xf32, #tpu.memory_space<vmem>>, vector<8x32xf32>,
      %c6_i32 = arith.constant 6 : i32
      %c8_i32_87 = arith.constant 8 : i32
      %273 = arith.muli %c6_i32, %c8_i32_87 : i32
      %274 = tpu.assume_multiple %273, 8 : i32
      %275 = arith.index_cast %274 : i32 to index
      %c0_88 = arith.constant 0 : index
      %276 = vector.load %arg17[%275, %c0_88] : memref<64x96xf32, #tpu.memory_space<vmem>>, vector<8x96xf32>
      %cst_89 = arith.constant dense<0.000000e+00> : vector<8x96xf32>
      %277 = tpu.matmul %270, %65, %cst_89 {dimension_numbers = #tpu.dot_dimension_numbers<[1], [0], [0], [1], [0, 0, 1, 1], [], []>} : vector<8x32xf32>, vector<32x96xf32>, vector<8x96xf32> -> vector<8x96xf32>
      %278 = arith.addf %277, %68 : vector<8x96xf32>
      %279 = vector.extract_strided_slice %276 {offsets = [0, 0], sizes = [8, 32], strides = [1, 1]} : vector<8x96xf32> to vector<8x32xf32>
      %280 = vector.extract_strided_slice %278 {offsets = [0, 0], sizes = [8, 32], strides = [1, 1]} : vector<8x96xf32> to vector<8x32xf32>
      %281 = arith.addf %279, %280 : vector<8x32xf32>
      %282 = arith.negf %281 : vector<8x32xf32>
      %283 = math.exp %282 : vector<8x32xf32>
      %cst_90 = arith.constant 1.000000e+00 : f32
      %284 = vector.broadcast %cst_90 : f32 to vector<8x32xf32>
      %285 = arith.addf %284, %283 : vector<8x32xf32>
      %286 = arith.divf %284, %285 : vector<8x32xf32>
      %287 = vector.extract_strided_slice %276 {offsets = [0, 32], sizes = [8, 32], strides = [1, 1]} : vector<8x96xf32> to vector<8x32xf32>
      %288 = vector.extract_strided_slice %278 {offsets = [0, 32], sizes = [8, 32], strides = [1, 1]} : vector<8x96xf32> to vector<8x32xf32>
      %289 = arith.addf %287, %288 : vector<8x32xf32>
      %290 = arith.negf %289 : vector<8x32xf32>
      %291 = math.exp %290 : vector<8x32xf32>
      %cst_91 = arith.constant 1.000000e+00 : f32
      %292 = vector.broadcast %cst_91 : f32 to vector<8x32xf32>
      %293 = arith.addf %292, %291 : vector<8x32xf32>
      %294 = arith.divf %292, %293 : vector<8x32xf32>
      %295 = vector.extract_strided_slice %276 {offsets = [0, 64], sizes = [8, 32], strides = [1, 1]} : vector<8x96xf32> to vector<8x32xf32>
      %296 = vector.extract_strided_slice %278 {offsets = [0, 64], sizes = [8, 32], strides = [1, 1]} : vector<8x96xf32> to vector<8x32xf32>
      %297 = arith.mulf %286, %296 : vector<8x32xf32>
      %298 = arith.addf %295, %297 : vector<8x32xf32>
      %299 = math.tanh %298 : vector<8x32xf32>
      %cst_92 = arith.constant 1.000000e+00 : f32
      %300 = vector.broadcast %cst_92 : f32 to vector<8x32xf32>
      %301 = arith.subf %300, %294 : vector<8x32xf32>
      %302 = arith.mulf %301, %299 : vector<8x32xf32>
      %303 = arith.mulf %294, %270 : vector<8x32xf32>
      %304 = arith.addf %302, %303 : vector<8x32xf32>
      %305 = arith.index_cast %274 : i32 to index
      %c0_93 = arith.constant 0 : index
      %306 = vector.load %arg16[%305, %c0_93] : memref<64x32xf32, #tpu.memory_space<vmem>>, vector<8x32xf32>
      tpu.vector_store %arg16[%305, %c0_93], %304 {strides = array<i32>} : memref<64x32xf32, #tpu.memory_space<vmem>>, vector<8x32xf32>,
      %c7_i32 = arith.constant 7 : i32
      %c8_i32_94 = arith.constant 8 : i32
      %307 = arith.muli %c7_i32, %c8_i32_94 : i32
      %308 = tpu.assume_multiple %307, 8 : i32
      %309 = arith.index_cast %308 : i32 to index
      %c0_95 = arith.constant 0 : index
      %310 = vector.load %arg17[%309, %c0_95] : memref<64x96xf32, #tpu.memory_space<vmem>>, vector<8x96xf32>
      %cst_96 = arith.constant dense<0.000000e+00> : vector<8x96xf32>
      %311 = tpu.matmul %304, %65, %cst_96 {dimension_numbers = #tpu.dot_dimension_numbers<[1], [0], [0], [1], [0, 0, 1, 1], [], []>} : vector<8x32xf32>, vector<32x96xf32>, vector<8x96xf32> -> vector<8x96xf32>
      %312 = arith.addf %311, %68 : vector<8x96xf32>
      %313 = vector.extract_strided_slice %310 {offsets = [0, 0], sizes = [8, 32], strides = [1, 1]} : vector<8x96xf32> to vector<8x32xf32>
      %314 = vector.extract_strided_slice %312 {offsets = [0, 0], sizes = [8, 32], strides = [1, 1]} : vector<8x96xf32> to vector<8x32xf32>
      %315 = arith.addf %313, %314 : vector<8x32xf32>
      %316 = arith.negf %315 : vector<8x32xf32>
      %317 = math.exp %316 : vector<8x32xf32>
      %cst_97 = arith.constant 1.000000e+00 : f32
      %318 = vector.broadcast %cst_97 : f32 to vector<8x32xf32>
      %319 = arith.addf %318, %317 : vector<8x32xf32>
      %320 = arith.divf %318, %319 : vector<8x32xf32>
      %321 = vector.extract_strided_slice %310 {offsets = [0, 32], sizes = [8, 32], strides = [1, 1]} : vector<8x96xf32> to vector<8x32xf32>
      %322 = vector.extract_strided_slice %312 {offsets = [0, 32], sizes = [8, 32], strides = [1, 1]} : vector<8x96xf32> to vector<8x32xf32>
      %323 = arith.addf %321, %322 : vector<8x32xf32>
      %324 = arith.negf %323 : vector<8x32xf32>
      %325 = math.exp %324 : vector<8x32xf32>
      %cst_98 = arith.constant 1.000000e+00 : f32
      %326 = vector.broadcast %cst_98 : f32 to vector<8x32xf32>
      %327 = arith.addf %326, %325 : vector<8x32xf32>
      %328 = arith.divf %326, %327 : vector<8x32xf32>
      %329 = vector.extract_strided_slice %310 {offsets = [0, 64], sizes = [8, 32], strides = [1, 1]} : vector<8x96xf32> to vector<8x32xf32>
      %330 = vector.extract_strided_slice %312 {offsets = [0, 64], sizes = [8, 32], strides = [1, 1]} : vector<8x96xf32> to vector<8x32xf32>
      %331 = arith.mulf %320, %330 : vector<8x32xf32>
      %332 = arith.addf %329, %331 : vector<8x32xf32>
      %333 = math.tanh %332 : vector<8x32xf32>
      %cst_99 = arith.constant 1.000000e+00 : f32
      %334 = vector.broadcast %cst_99 : f32 to vector<8x32xf32>
      %335 = arith.subf %334, %328 : vector<8x32xf32>
      %336 = arith.mulf %335, %333 : vector<8x32xf32>
      %337 = arith.mulf %328, %304 : vector<8x32xf32>
      %338 = arith.addf %336, %337 : vector<8x32xf32>
      %339 = arith.index_cast %308 : i32 to index
      %c0_100 = arith.constant 0 : index
      %340 = vector.load %arg16[%339, %c0_100] : memref<64x32xf32, #tpu.memory_space<vmem>>, vector<8x32xf32>
      tpu.vector_store %arg16[%339, %c0_100], %338 {strides = array<i32>} : memref<64x32xf32, #tpu.memory_space<vmem>>, vector<8x32xf32>,
      %c8_i32_101 = arith.constant 8 : i32
      %cst_102 = arith.constant 0.000000e+00 : f32
      %341 = vector.broadcast %cst_102 : f32 to vector<1x1xf32>
      %c0_103 = arith.constant 0 : index
      %c0_104 = arith.constant 0 : index
      %342 = vector.load %arg15[%c0_103, %c0_104] : memref<1x1xf32, #tpu.memory_space<vmem>>, vector<1x1xf32>
      tpu.vector_store %arg15[%c0_103, %c0_104], %341 {strides = array<i32>} : memref<1x1xf32, #tpu.memory_space<vmem>>, vector<1x1xf32>,
    } else {
    }
    %c32_i32 = arith.constant 32 : i32
    %3 = arith.muli %arg0, %c32_i32 : i32
    %4 = tpu.assume_multiple %3, 32 : i32
    %5 = arith.index_cast %4 : i32 to index
    %c0 = arith.constant 0 : index
    %6 = vector.load %arg16[%5, %c0] : memref<64x32xf32, #tpu.memory_space<vmem>>, vector<32x32xf32>
    %c0_1 = arith.constant 0 : index
    %c0_2 = arith.constant 0 : index
    %7 = vector.load %arg10[%c0_1, %c0_2] : memref<32x32xf32, #tpu.memory_space<vmem>>, vector<32x32xf32>
    %cst = arith.constant dense<0.000000e+00> : vector<32x32xf32>
    %8 = tpu.matmul %6, %7, %cst {dimension_numbers = #tpu.dot_dimension_numbers<[1], [0], [0], [1], [0, 0, 1, 1], [], []>} : vector<32x32xf32>, vector<32x32xf32>, vector<32x32xf32> -> vector<32x32xf32>
    %c0_3 = arith.constant 0 : index
    %c0_4 = arith.constant 0 : index
    %9 = vector.load %arg11[%c0_3, %c0_4] : memref<1x32xf32, #tpu.memory_space<vmem>>, vector<1x32xf32>
    %10 = vector.broadcast %9 : vector<1x32xf32> to vector<32x32xf32>
    %11 = arith.addf %8, %10 : vector<32x32xf32>
    %12 = math.tanh %11 : vector<32x32xf32>
    %c0_5 = arith.constant 0 : index
    %c0_6 = arith.constant 0 : index
    %13 = vector.load %arg12[%c0_5, %c0_6] : memref<32x128xf32, #tpu.memory_space<vmem>>, vector<32x128xf32>
    %cst_7 = arith.constant dense<0.000000e+00> : vector<32x128xf32>
    %14 = tpu.matmul %12, %13, %cst_7 {dimension_numbers = #tpu.dot_dimension_numbers<[1], [0], [0], [1], [0, 0, 1, 1], [], []>} : vector<32x32xf32>, vector<32x128xf32>, vector<32x128xf32> -> vector<32x128xf32>
    %c0_8 = arith.constant 0 : index
    %c0_9 = arith.constant 0 : index
    %15 = vector.load %arg13[%c0_8, %c0_9] : memref<1x128xf32, #tpu.memory_space<vmem>>, vector<1x128xf32>
    %16 = vector.broadcast %15 : vector<1x128xf32> to vector<32x128xf32>
    %17 = arith.addf %14, %16 : vector<32x128xf32>
    %cst_10 = arith.constant dense<0xFF800000> : vector<32xf32>
    %18 = vector.multi_reduction <maximumf>, %17, %cst_10 [1] : vector<32x128xf32> to vector<32xf32>
    %19 = vector.shape_cast %18 : vector<32xf32> to vector<32x1xf32>
    %20 = vector.broadcast %19 : vector<32x1xf32> to vector<32x128xf32>
    %21 = arith.subf %17, %20 : vector<32x128xf32>
    %22 = math.exp %21 : vector<32x128xf32>
    %cst_11 = arith.constant dense<0.000000e+00> : vector<32xf32>
    %23 = vector.multi_reduction <add>, %22, %cst_11 [1] : vector<32x128xf32> to vector<32xf32>
    %24 = vector.shape_cast %23 : vector<32xf32> to vector<32x1xf32>
    %25 = math.log %24 : vector<32x1xf32>
    %26 = vector.broadcast %25 : vector<32x1xf32> to vector<32x128xf32>
    %27 = arith.subf %21, %26 : vector<32x128xf32>
    %c0_12 = arith.constant 0 : index
    %c0_13 = arith.constant 0 : index
    %28 = vector.load %arg14[%c0_12, %c0_13] : memref<32x128xf32, #tpu.memory_space<vmem>>, vector<32x128xf32>
    tpu.vector_store %arg14[%c0_12, %c0_13], %27 {strides = array<i32>} : memref<32x128xf32, #tpu.memory_space<vmem>>, vector<32x128xf32>,
    %29 = arith.index_cast %4 : i32 to index
    %c0_14 = arith.constant 0 : index
    %30 = vector.load %arg2[%29, %c0_14] : memref<64x1xi32, #tpu.memory_space<vmem>>, vector<32x1xi32>
    %31 = tpu.iota {dimensions = array<i32: 1>} : vector<32x128xi32>
    %32 = vector.broadcast %30 : vector<32x1xi32> to vector<32x128xi32>
    %33 = arith.cmpi eq, %31, %32 : vector<32x128xi32>
    %cst_15 = arith.constant 0.000000e+00 : f32
    %34 = vector.broadcast %cst_15 : f32 to vector<32x128xf32>
    %35 = arith.select %33, %27, %34 : vector<32x128xi1>, vector<32x128xf32>
    %cst_16 = arith.constant dense<0.000000e+00> : vector<32xf32>
    %36 = vector.multi_reduction <add>, %35, %cst_16 [1] : vector<32x128xf32> to vector<32xf32>
    %37 = vector.shape_cast %36 : vector<32xf32> to vector<32x1xf32>
    %c0_i32_17 = arith.constant 0 : i32
    %38 = vector.broadcast %c0_i32_17 : i32 to vector<32x1xi32>
    %39 = arith.cmpi ne, %30, %38 : vector<32x1xi32>
    %cst_18 = arith.constant 0.000000e+00 : f32
    %40 = vector.broadcast %cst_18 : f32 to vector<32x1xf32>
    %41 = arith.select %39, %37, %40 : vector<32x1xi1>, vector<32x1xf32>
    %42 = vector.shape_cast %41 : vector<32x1xf32> to vector<1x32x1xf32>
    %cst_19 = arith.constant dense<0.000000e+00> : vector<1xf32>
    %43 = vector.multi_reduction <add>, %42, %cst_19 [1, 2] : vector<1x32x1xf32> to vector<1xf32>
    %44 = vector.shape_cast %43 : vector<1xf32> to vector<1x1x1xf32>
    %45 = vector.extract %44[0, 0, 0] : f32 from vector<1x1x1xf32>
    %cst_20 = arith.constant 0.000000e+00 : f32
    %46 = arith.subf %cst_20, %45 : f32
    %c0_21 = arith.constant 0 : index
    %c0_22 = arith.constant 0 : index
    %47 = vector.load %arg15[%c0_21, %c0_22] : memref<1x1xf32, #tpu.memory_space<vmem>>, vector<1x1xf32>
    %48 = vector.broadcast %46 : f32 to vector<1x1xf32>
    %49 = arith.addf %47, %48 : vector<1x1xf32>
    %c0_23 = arith.constant 0 : index
    %c0_24 = arith.constant 0 : index
    %50 = vector.load %arg15[%c0_23, %c0_24] : memref<1x1xf32, #tpu.memory_space<vmem>>, vector<1x1xf32>
    tpu.vector_store %arg15[%c0_23, %c0_24], %49 {strides = array<i32>} : memref<1x1xf32, #tpu.memory_space<vmem>>, vector<1x1xf32>,
    return
  }
  func.func @transform_0(%arg0: i32) -> (i32, i32) {
    %c0_i32 = arith.constant 0 : i32
    %c0_i32_0 = arith.constant 0 : i32
    %c0_i32_1 = arith.constant 0 : i32
    return %c0_i32, %c0_i32_0 : i32, i32
  }
  func.func @transform_1(%arg0: i32) -> (i32, i32) {
    %c0_i32 = arith.constant 0 : i32
    %c0_i32_0 = arith.constant 0 : i32
    %c0_i32_1 = arith.constant 0 : i32
    return %c0_i32, %c0_i32_0 : i32, i32
  }
  func.func @transform_2(%arg0: i32) -> (i32, i32) {
    %c0_i32 = arith.constant 0 : i32
    %c0_i32_0 = arith.constant 0 : i32
    %c0_i32_1 = arith.constant 0 : i32
    return %c0_i32, %c0_i32_0 : i32, i32
  }
  func.func @transform_3(%arg0: i32) -> (i32, i32) {
    %c0_i32 = arith.constant 0 : i32
    %c0_i32_0 = arith.constant 0 : i32
    %c0_i32_1 = arith.constant 0 : i32
    return %c0_i32, %c0_i32_0 : i32, i32
  }
  func.func @transform_4(%arg0: i32) -> (i32, i32) {
    %c0_i32 = arith.constant 0 : i32
    %c0_i32_0 = arith.constant 0 : i32
    %c0_i32_1 = arith.constant 0 : i32
    return %c0_i32, %c0_i32_0 : i32, i32
  }
  func.func @transform_5(%arg0: i32) -> (i32, i32) {
    %c0_i32 = arith.constant 0 : i32
    %c0_i32_0 = arith.constant 0 : i32
    %c0_i32_1 = arith.constant 0 : i32
    return %c0_i32, %c0_i32_0 : i32, i32
  }
  func.func @transform_6(%arg0: i32) -> (i32, i32) {
    %c0_i32 = arith.constant 0 : i32
    %c0_i32_0 = arith.constant 0 : i32
    %c0_i32_1 = arith.constant 0 : i32
    return %c0_i32, %c0_i32_0 : i32, i32
  }
  func.func @transform_7(%arg0: i32) -> (i32, i32) {
    %c0_i32 = arith.constant 0 : i32
    %c0_i32_0 = arith.constant 0 : i32
    %c0_i32_1 = arith.constant 0 : i32
    return %c0_i32, %c0_i32_0 : i32, i32
  }
  func.func @transform_8(%arg0: i32) -> (i32, i32) {
    %c0_i32 = arith.constant 0 : i32
    %c0_i32_0 = arith.constant 0 : i32
    %c0_i32_1 = arith.constant 0 : i32
    return %c0_i32, %c0_i32_0 : i32, i32
  }
  func.func @transform_9(%arg0: i32) -> (i32, i32) {
    %c0_i32 = arith.constant 0 : i32
    %c0_i32_0 = arith.constant 0 : i32
    %c0_i32_1 = arith.constant 0 : i32
    return %c0_i32, %c0_i32_0 : i32, i32
  }
  func.func @transform_10(%arg0: i32) -> (i32, i32) {
    %c0_i32 = arith.constant 0 : i32
    %c0_i32_0 = arith.constant 0 : i32
    %c0_i32_1 = arith.constant 0 : i32
    return %c0_i32, %c0_i32_0 : i32, i32
  }
  func.func @transform_11(%arg0: i32) -> (i32, i32) {
    %c0_i32 = arith.constant 0 : i32
    %c0_i32_0 = arith.constant 0 : i32
    %c0_i32_1 = arith.constant 0 : i32
    return %c0_i32, %c0_i32_0 : i32, i32
  }
  func.func @transform_12(%arg0: i32) -> (i32, i32) {
    %c0_i32 = arith.constant 0 : i32
    %c0_i32_0 = arith.constant 0 : i32
    %c0_i32_1 = arith.constant 0 : i32
    return %c0_i32, %c0_i32_0 : i32, i32
  }
  func.func @transform_13(%arg0: i32) -> (i32, i32) {
    %c0_i32 = arith.constant 0 : i32
    %c0_i32_0 = arith.constant 0 : i32
    return %arg0, %c0_i32 : i32, i32
  }
  func.func @transform_14(%arg0: i32) -> (i32, i32) {
    %c0_i32 = arith.constant 0 : i32
    %c0_i32_0 = arith.constant 0 : i32
    %c0_i32_1 = arith.constant 0 : i32
    return %c0_i32, %c0_i32_0 : i32, i32
  }
}

</mosaic_0001>

<bundles_post_ra>
// kernel: tpu_custom_call.1
= control target key start
LH: loop header
LB: loop body
LE: loop exit
PB: predicated region body
PF: predicated region fallthrough
CT: control target
= control target key end

     0   :  { %s2264_s0 = inlined_call_operand.vmem [shape: f32[64,32], index: 0, kind: input, shape index: {}]   ;;  %s2265_s1 = inlined_call_operand.vmem [shape: s32[64,1], index: 1, kind: input, shape index: {}]   ;;  %s2266_s2 = inlined_call_operand.hbm [shape: f32[8,32], index: 2, kind: input, shape index: {}]   ;;  %s2267_s3 = inlined_call_operand.vmem [shape: f32[32,32], index: 3, kind: input, shape index: {}]   ;;  %s2268_s4 = inlined_call_operand.vmem [shape: f32[1,32], index: 4, kind: input, shape index: {}]   ;;  %s2269_s5 = inlined_call_operand.vmem [shape: f32[32,96], index: 5, kind: input, shape index: {}]   ;;  %s2270_s6 = inlined_call_operand.vmem [shape: f32[1,96], index: 6, kind: input, shape index: {}]   ;;  %s2271_s7 = inlined_call_operand.vmem [shape: f32[32,96], index: 7, kind: input, shape index: {}]   ;;  %s2272_s8 = inlined_call_operand.vmem [shape: f32[1,96], index: 8, kind: input, shape index: {}]   ;;  %s2273_s9 = inlined_call_operand.vmem [shape: f32[32,32], index: 9, kind: input, shape index: {}]   ;;  %s2274_s10 = inlined_call_operand.vmem [shape: f32[1,32], index: 10, kind: input, shape index: {}]   ;;  %s2275_s11 = inlined_call_operand.vmem [shape: f32[32,128], index: 11, kind: input, shape index: {}]   ;;  %s2276_s12 = inlined_call_operand.vmem [shape: f32[1,128], index: 12, kind: input, shape index: {}]   ;;  %s2277_s13 = inlined_call_operand.hbm [shape: f32[64,128], index: 13, kind: output, shape index: {0}]   ;;  %s2278_s14 = inlined_call_operand.hbm [shape: f32[1,1], index: 14, kind: output, shape index: {1}]  }
   0x1   :  { %2280 = sst [smem:[#allocation14_spill]] %s2264_s0 }
   0x2   :  { %2281 = sst [smem:[#allocation15_spill]] %s2265_s1 }
   0x3   :  { %2282 = sst [smem:[#allocation16_spill]] %s2266_s2 }
   0x4   :  { %2283 = sst [smem:[#allocation17_spill]] %s2267_s3 }
   0x5   :  { %2284 = sst [smem:[#allocation18_spill]] %s2268_s4 }
   0x6   :  { %2285 = sst [smem:[#allocation19_spill]] %s2269_s5 }
   0x7   :  { %2286 = sst [smem:[#allocation20_spill]] %s2270_s6 }
   0x8   :  { %20 = vsyncpa [#allocation5], 0 }
   0x9   :  { %21 = vsyncpa [#allocation6], 0 }
   0xa   :  { %23 = vsyncpa [#allocation6 + $0x1], 0 }
   0xb   :  { %24 = vsyncpa [#allocation9], 0  ;;  %s1905_s29 = smov 0   ;;  %s1907_s30 = smov 0  }
   0xc   :  { %s1909_s15 = smov 0   ;;  %s1911_s16 = smov 0  }
   0xd LB: > { %s1926_s17 = sadd.s32 4294967295, %s1819_s16   ;;  %s1478_s18 = sadd.s32 4294967294, %s1819_s16   ;;  %s1819_s16 = sphi %s1911_s16, %s2302_s16   ;;  %s1815_s15 = sphi %s1909_s15, %s2301_s15   ;;  %s1811_s30 = sphi %s1907_s30, %s2300_s30   ;;  %s1807_s29 = sphi %s1905_s29, %s2299_s29  }
   0xe   : > { %s1930_s19 = sadd.s32 1, %s1819_s16   ;;  %s310_s20 = sadd.s32 1, %s1815_s15 }
   0xf   : > { %s307_s21 = ssub.s32 %s1819_s16, %s1930_s19  ;;  %p320_p0 = scmp.ne.s32.totalorder %s1815_s15, %s1811_s30 }
  0x10   : > { %p308_p1 = scmp.eq.s32.totalorder %s307_s21, 0  ;;  %p321_p2 = scmp.eq.s32.totalorder %s1926_s17, 1 }
  0x11   : > { %p326_p3 = scmp.ne.s32.totalorder %s1811_s30, %s1807_s29  ;;  %p327_p4 = scmp.eq.s32.totalorder %s1478_s18, 1 }
  0x12   : > { %s1941_s22 = scalar_select %p308_p1, %s1815_s15, %s310_s20  }
  0x13   : > { %p1945_p5 = por %p321_p2, %p320_p0  ;;  %p1949_p6 = por %p327_p4, %p326_p3 }
  0x14   : > { %2287 = sst [smem:[#allocation13_spill]] %s1941_s22  ;;  %p1479_p7 = scmp.ge.s32.totalorder %s1819_s16, 1 }
  0x15   : > { %p355_p8 = scmp.lt.s32.totalorder %s1819_s16, 3  ;;  %p1480_p9 = scmp.ne.s32.totalorder %s1926_s17, 0 }
  0x16   : > { %p1563_p10 = scmp.eq.s32.totalorder %s1926_s17, 0  ;;  %s2290_s2 = sld [smem:[#allocation16_spill]] }
  0x17   : > { %p356_p11 = pnand %p1479_p7, %p355_p8  ;;  %s1821_s28 = smov [#allocation4]  }
  0x18   : > { %s375_s18 = sshll.u32 %s1821_s28, 4  ;;  %s376_s18 = int_to_ptr.vmem [resolvable:$true] %s375_s18 }
  0x19   : > { %p1555_p12 = pneg %p356_p11  ;;  %418 = sbr.rel (%p356_p11) target bundleno = 5663 (0x161f), region = 72 }
  0x1b   : > { %p1556_p13 = pnand %p1563_p10, %p1555_p12 }
  0x1c   : > { %s373_s27 = sshll.u32 %s2290_s2, 4  ;;  %s374_s27 = int_to_ptr.hbm [resolvable:$true] %s373_s27 }
  0x1d   : > { %1558 = dma.hbm_to_vmem [thread:$0]  (!%p1556_p13), %s374_s27, 128, %s376_s18, [#allocation5]  }
  0x1e   : > { %1794 = dma.done.wait (%p1563_p10), [#allocation5], 128  }
  0x1f   : > { %1796 = vsyncadd (%p1563_p10), [#allocation5], 4294967168  ;;  %s2279_s20 = sand.u32 1, %s1811_s30   ;;  %464 = sbr.rel (%p1480_p9) target bundleno = 4794 (0x12ba), region = 80 }
  0x20   : > { %s1483_s21 = sshll.u32 %s2279_s20, 5  ;;  %s2291_s5 = sld [smem:[#allocation19_spill]] (!%p1480_p9) }
  0x21   : > { %s1963_s22 = scalar_lea.vmem [#allocation7], %s1483_s21  ;;  %s2292_s0 = sld [smem:[#allocation14_spill]] (!%p1480_p9) }
  0x22   : > { %s2293_s3 = sld [smem:[#allocation17_spill]] (!%p1480_p9)  ;;  %s1822_s18 = smov (!%p1480_p9), 64  }
  0x23   : > { %s2294_s6 = sld [smem:[#allocation20_spill]] (!%p1480_p9)  ;;  %s1823_s21 = smov (!%p1480_p9), 96  }
  0x24   : > { %vm481_vm0 = vcmask 261120   ;;  %v556_v9 = vld [vmem:[#allocation4] sm:$0xff]  ;;  %v2003_v11 = vld [vmem:[%s2271_s7 + $0x18] sm:$0xff]  ;;  %v2008_v12 = vld [vmem:[%s2271_s7 + $0x10] sm:$0xff]  ;;  %vm547_vm1 = vcmask 785408   ;;  %s2295_s4 = sld [smem:[#allocation18_spill]] }
  0x25   : > { %684 = vmatpush.msra.mxu3 %v2003_v11  ;;  %v2023_v14 = vld [vmem:[%s2271_s7 + $0x8] sm:$0xff]  ;;  %v2028_v15 = vld [vmem:[%s2271_s7] sm:$0xff]  ;;  %s1824_s25 = smov 32  }
  0x26   : > { %v476_v0 = vld [vmem:[%s2291_s5 + $0x18] sm:$0xff]  ;;  %v475_v1 = vld [vmem:[%s2291_s5 + $0x10] sm:$0xff]  ;;  %v474_v2 = vld [vmem:[%s2291_s5 + $0x8] sm:$0xff] }
  0x27   : > { %1527 = vmatpush.msra.mxu1 %v476_v0  ;;  %1528 = vmatpush.msra.mxu2 %v476_v0  ;;  %v473_v3 = vld [vmem:[%s2291_s5] sm:$0xff]  ;;  %v470_v4 = vld [vmem:[%s2292_s0 + $0x28] sm:$0xff]  ;;  %v471_v10 = vld [vmem:[%s2292_s0 + $0x30] sm:$0xff] }
  0x28   : > { %518 = vmatpush.msra.mxu0 %v476_v0  ;;  %v560_v5 = vld [vmem:[%s2293_s3 + $0x18] sm:$0xff]  ;;  %v559_v6 = vld [vmem:[%s2293_s3 + $0x10] sm:$0xff]  ;;  %v558_v7 = vld [vmem:[%s2293_s3 + $0x8] sm:$0xff]  ;;  %685 = vmatpush.msra.mxu3 %v2008_v12 }
  0x29   : > { %1529 = vmatpush.msra.mxu1 %v475_v1  ;;  %1530 = vmatpush.msra.mxu2 %v475_v1  ;;  %v557_v8 = vld [vmem:[%s2293_s3] sm:$0xff]  ;;  %v472_v13 = vld [vmem:[%s2292_s0 + $0x38] sm:$0xff]  ;;  %v466_v53 = vld [vmem:[%s2292_s0 + $0x8] sm:$0xff] }
  0x2a   : > { %519 = vmatpush.msra.mxu0 %v475_v1  ;;  %v465_v16 = vld [vmem:[%s2292_s0] sm:$0xff]  ;;  %686 = vmatpush.msra.mxu3 %v2023_v14 }
  0x2b   : > { %1531 = vmatpush.msra.mxu1 %v474_v2  ;;  %1532 = vmatpush.msra.mxu2 %v474_v2  ;;  %v2055_v17 = vld [vmem:[%s2294_s6] ss:$0 sm:$0xff] }
  0x2c   : > { %520 = vmatpush.msra.mxu0 %v474_v2  ;;  %687 = vmatpush.msra.mxu3 %v2028_v15  ;;  %v1610_v20 = vld [vmem:[%s2295_s4] ss:$0 sm:$0xff] }
  0x2d   : > { %1533 = vmatpush.msra.mxu1 %v473_v3  ;;  %1534 = vmatpush.msra.mxu2 %v473_v3  ;;  %v2076_v30 = vld [vmem:[%s2272_s8] ss:$0 sm:$0xff] }
  0x2e   : > { %1490 = vmatmul.msk.f32.vlgmr.msra.gmra.mxu1 %vm481_vm0, %v470_v4  ;;  %521 = vmatpush.msra.mxu0 %v473_v3 }
  0x2f   : > { %580 = vmatpush.msrb.mxu1 %v560_v5  ;;  %1491 = vmatmul.msk.f32.vlgmr.msra.gmra.mxu2 %vm481_vm0, %v471_v10 }
  0x30   : > { %613 = vmatpush.msrb.mxu2 %v2003_v11  ;;  %1485 = vmatmul.msk.f32.vlgmr.msra.gmra.mxu0 %vm481_vm0, %v465_v16 }
  0x31   : > { %581 = vmatpush.msrb.mxu1 %v559_v6  ;;  %891 = vmatpush.msrb.mxu3 %v2003_v11 }
  0x32   : > { %614 = vmatpush.msrb.mxu2 %v2008_v12 }
  0x33   : > { %582 = vmatpush.msrb.mxu1 %v558_v7  ;;  %892 = vmatpush.msrb.mxu3 %v2008_v12 }
  0x34   : > { %615 = vmatpush.msrb.mxu2 %v2023_v14 }
  0x35   : > { %583 = vmatpush.msrb.mxu1 %v557_v8  ;;  %893 = vmatpush.msrb.mxu3 %v2023_v14 }
  0x36   : > { %1493 = vmatmul.msk.f32.vlgmr.msrb.gmra.mxu1 %vm481_vm0, %v556_v9  ;;  %616 = vmatpush.msrb.mxu2 %v2028_v15 }
  0x37   : > { %753 = vmatpush.msra.mxu1 %v2003_v11  ;;  %1492 = vmatmul.msk.f32.gmra.mxu2 %vm481_vm0, %v472_v13 }
  0x38   : > { %822 = vmatpush.msra.mxu2 %v2003_v11  ;;  %894 = vmatpush.msrb.mxu3 %v2028_v15 }
  0x39   : > { %754 = vmatpush.msra.mxu1 %v2008_v12  ;;  %1486 = vmatmul.msk.f32.gmra.mxu0 %vm481_vm0, %v466_v53 }
  0x3a   : > { %823 = vmatpush.msra.mxu2 %v2008_v12 }
  0x3b   : > { %755 = vmatpush.msra.mxu1 %v2023_v14 }
  0x3c   : > { %824 = vmatpush.msra.mxu2 %v2023_v14 }
  0x3d   : > { %756 = vmatpush.msra.mxu1 %v2028_v15 }
  0x3e   : > { %825 = vmatpush.msra.mxu2 %v2028_v15 }
  0x3f   : > { %960 = vmatpush.msrb.mxu1 %v2003_v11 }
  0x41   : > { %961 = vmatpush.msrb.mxu1 %v2008_v12 }
  0x43   : > { %962 = vmatpush.msrb.mxu1 %v2023_v14 }
  0x45   : > { %963 = vmatpush.msrb.mxu1 %v2028_v15 }
  0xab   : > { %v538_v18 = vpop.f32.mrf.mxu1 }
  0xac   : > { %v539_v19 = vadd.f32 %v2055_v17, %v538_v18 }
  0xad   : > { %v523_v26 = vpop.f32.mrf.mxu0 }
  0xae   : > { %553 = vst.msk [vmem:[#allocation3 + $0x28] sm:$0xff] %vm547_vm1, %v539_v19  ;;  %v524_v27 = vadd.f32 %v2055_v17, %v523_v26 }
  0xb0   : > { %548 = vst.msk [vmem:[#allocation3] sm:$0xff] %vm547_vm1, %v524_v27 }
  0xb2   : > { %v541_v24 = vpop.f32.mrf.mxu2 }
  0xb3   : > { %v585_v21 = vpop.f32.mrf.mxu1  ;;  %v542_v25 = vadd.f32 %v2055_v17, %v541_v24 }
  0xb4   : > { %v586_v22 = vadd.f32 %v1610_v20, %v585_v21 }
  0xb5   : > { %554 = vst.msk [vmem:[#allocation3 + $0x30] sm:$0xff] %vm547_vm1, %v542_v25 }
  0xb6   : > { %1612 = vtanh.f32 %v586_v22  ;;  %v526_v61 = vpop.f32.mrf.mxu0  ;;  %v467_v22 = vld [vmem:[%s2292_s0 + $0x10] sm:$0xff] }
  0xb7   : > { %v597_v33 = vld [vmem:[#allocation3] sm:$0xff]  ;;  %v527_v62 = vadd.f32 %v2055_v17, %v526_v61  ;;  %1487 = vmatmul.msk.f32.gmra.mxu0 %vm481_vm0, %v467_v22 }
  0xb8   : > { %v469_v22 = vld [vmem:[%s2292_s0 + $0x20] sm:$0xff] }
  0xb9   : > { %549 = vst.msk [vmem:[#allocation3 + $0x8] sm:$0xff] %vm547_vm1, %v527_v62 }
  0xba   : > { %v544_v28 = vpop.f32.mrf.mxu2 }
  0xbb   : > { %v545_v29 = vadd.f32 %v2055_v17, %v544_v28 }
  0xbc   : > { %v1613_v23 = vpop.eup %1612 }
  0xbd   : > { %1494 = vmatmul.msk.f32.vlgmr.msrb.gmra.mxu2 %vm481_vm0, %v1613_v23  ;;  %555 = vst.msk [vmem:[#allocation3 + $0x38] sm:$0xff] %vm547_vm1, %v545_v29 }
  0xbe   : > { %1029 = vmatpush.msrb.mxu2 %v2003_v11 }
  0xc0   : > { %1030 = vmatpush.msrb.mxu2 %v2008_v12  ;;  %v669_v1 = vld [vmem:[#allocation3 + $0x8] sm:$0xff] }
  0xc2   : > { %1031 = vmatpush.msrb.mxu2 %v2023_v14 }
  0xc4   : > { %1032 = vmatpush.msrb.mxu2 %v2028_v15 }
 0x134   : > { %v529_v29 = vpop.f32.mrf.mxu0 }
 0x140   : > { %v618_v31 = vpop.f32.mrf.mxu2 }
 0x141   : > { %v619_v32 = vadd.f32 %v2076_v30, %v618_v31  ;;  %v530_v31 = vadd.f32 %v2055_v17, %v529_v29 }
 0x143   : > { %642 = vrot.lane.b32.xlu0 %v619_v32, %s1822_s18  ;;  %v621_v34 = vadd.f32 %v619_v32, %v597_v33  ;;  %550 = vst.msk [vmem:[#allocation3 + $0x10] sm:$0xff] %vm547_vm1, %v530_v31 }
 0x145   : > { %v1495_v35 = vmul.f32 -1.442695, %v621_v34 }
 0x147   : > { %1614 = vpow2.f32 %v1495_v35 }
 0x14a   : > { %v738_v34 = vld [vmem:[#allocation3 + $0x10] sm:$0xff] }
 0x14d   : > { %v1615_v36 = vpop.eup %1614 }
 0x14e   : > { %v625_v37 = vadd.f32 1.0, %v1615_v36 }
 0x150   : > { %1616 = vrcp.f32 %v625_v37  ;;  %v637_v43 = vand.u32 2147483648, %v625_v37  ;;  %vm631_vm3 = vweird.f32 %v625_v37  ;;  %v635_v44 = vand.u32 2147483647, %v625_v37 }
 0x152   : > { %v638_v46 = vor.u32 1.1754944e-38, %v637_v43  ;;  %vm636_vm5 = vcmp.eq.f32.partialorder %v635_v44, 8.507059e+37 }
 0x156   : > { %v1617_v38 = vpop.eup %1616 }
 0x157   : > { %v627_v39 = vmul.f32 %v1617_v38, %v625_v37  ;;  %vm632_vm2 = vweird.f32 %v1617_v38 }
 0x158   : > { %vm633_vm4 = vmor %vm631_vm3, %vm632_vm2 }
 0x159   : > { %v628_v40 = vsub.f32 1.0, %v627_v39 }
 0x15b   : > { %v629_v41 = vmul.f32 %v1617_v38, %v628_v40 }
 0x15d   : > { %v630_v42 = vadd.f32 %v1617_v38, %v629_v41 }
 0x15f   : > { %v634_v45 = vsel %vm633_vm4, %v1617_v38, %v630_v42 }
 0x160   : > { %v639_v48 = vsel %vm636_vm5, %v638_v46, %v634_v45 }
 0x161   : > { %v652_v55 = vsub.f32 1.0, %v639_v48 }
 0x1b5   : > { %v643_v47 = vpop.permute.xlu0 %642 }
 0x1b6   : > { %v645_v49 = vmul.f32 %v643_v47, %v639_v48 }
 0x1b8   : > { %647 = vrot.lane.b32.xlu0 %v645_v49, %s1822_s18 }
 0x22a   : > { %v648_v50 = vpop.permute.xlu0 %647 }
 0x22b   : > { %v650_v51 = vadd.f32 %v648_v50, %v597_v33 }
 0x22d   : > { %1618 = vtanh.f32 %v650_v51 }
 0x233   : > { %v1619_v52 = vpop.eup %1618 }
 0x234   : > { %654 = vrot.lane.b32.xlu1 %v1619_v52, %s1823_s21 }
 0x23c   : > { %658 = vrot.lane.b32.xlu1 %v1613_v23, %s1824_s25 }
 0x2a6   : > { %v655_v54 = vpop.permute.xlu1 %654 }
 0x2a7   : > { %v657_v57 = vmul.f32 %v655_v54, %v652_v55  ;;  %v468_v54 = vld [vmem:[%s2292_s0 + $0x18] sm:$0xff] }
 0x2a8   : > { %1488 = vmatmul.msk.f32.gmra.mxu0 %vm481_vm0, %v468_v54 }
 0x2ae   : > { %v659_v56 = vpop.permute.xlu1 %658 }
 0x2af   : > { %v661_v58 = vmul.f32 %v659_v56, %v639_v48 }
 0x2b0   : > { %1489 = vmatmul.msk.f32.gmra.mxu0 %vm481_vm0, %v469_v22 }
 0x2b1   : > { %v662_v59 = vadd.f32 %v661_v58, %v657_v57 }
 0x2b3   : > { %664 = vrot.lane.b32.xlu2 %v662_v59, %s1823_s21 }
 0x30d   : > { %v665_v60 = vpop.permute.xlu2 %664 }
 0x30e   : > { %667 = vst.msk [vmem:[#allocation2] sm:$0xff] %vm481_vm0, %v665_v60  ;;  %1496 = vmatmul.msk.f32.vlgmr.msra.gmra.mxu3 %vm481_vm0, %v665_v60 }
 0x30f   : > { %1098 = vmatpush.msra.mxu3 %v2003_v11 }
 0x311   : > { %1099 = vmatpush.msra.mxu3 %v2008_v12 }
 0x313   : > { %1100 = vmatpush.msra.mxu3 %v2023_v14 }
 0x315   : > { %1101 = vmatpush.msra.mxu3 %v2028_v15 }
 0x325   : > { %v532_v60 = vpop.f32.mrf.mxu0 }
 0x326   : > { %v533_v61 = vadd.f32 %v2055_v17, %v532_v60 }
 0x328   : > { %551 = vst.msk [vmem:[#allocation3 + $0x18] sm:$0xff] %vm547_vm1, %v533_v61  ;;  %v945_v61 = vld [vmem:[#allocation3 + $0x28] sm:$0xff] }
 0x391   : > { %v689_v63 = vpop.f32.mrf.mxu3 }
 0x392   : > { %v690_v0 = vadd.f32 %v2076_v30, %v689_v63 }
 0x394   : > { %713 = vrot.lane.b32.xlu2 %v690_v0, %s1822_s18  ;;  %v692_v2 = vadd.f32 %v690_v0, %v669_v1 }
 0x396   : > { %v1497_v3 = vmul.f32 -1.442695, %v692_v2 }
 0x398   : > { %1620 = vpow2.f32 %v1497_v3 }
 0x39e   : > { %v1621_v4 = vpop.eup %1620 }
 0x39f   : > { %v696_v5 = vadd.f32 1.0, %v1621_v4 }
 0x3a1   : > { %1622 = vrcp.f32 %v696_v5  ;;  %v708_v11 = vand.u32 2147483648, %v696_v5  ;;  %vm702_vm7 = vweird.f32 %v696_v5  ;;  %v706_v12 = vand.u32 2147483647, %v696_v5 }
 0x3a3   : > { %v709_v14 = vor.u32 1.1754944e-38, %v708_v11  ;;  %vm707_vm9 = vcmp.eq.f32.partialorder %v706_v12, 8.507059e+37 }
 0x3a7   : > { %v1623_v6 = vpop.eup %1622 }
 0x3a8   : > { %v698_v7 = vmul.f32 %v1623_v6, %v696_v5  ;;  %vm703_vm6 = vweird.f32 %v1623_v6 }
 0x3a9   : > { %vm704_vm8 = vmor %vm702_vm7, %vm703_vm6 }
 0x3aa   : > { %v699_v8 = vsub.f32 1.0, %v698_v7 }
 0x3ac   : > { %v700_v9 = vmul.f32 %v1623_v6, %v699_v8 }
 0x3ae   : > { %v701_v10 = vadd.f32 %v1623_v6, %v700_v9 }
 0x3b0   : > { %v705_v13 = vsel %vm704_vm8, %v1623_v6, %v701_v10 }
 0x3b1   : > { %v710_v16 = vsel %vm707_vm9, %v709_v14, %v705_v13 }
 0x3b2   : > { %v723_v23 = vsub.f32 1.0, %v710_v16  ;;  %v729_v25 = vmul.f32 %v710_v16, %v662_v59 }
 0x3ee   : > { %v714_v15 = vpop.permute.xlu2 %713 }
 0x3ef   : > { %v716_v18 = vmul.f32 %v714_v15, %v710_v16 }
 0x3f1   : > { %718 = vrot.lane.b32.xlu0 %v716_v18, %s1822_s18 }
 0x463   : > { %v719_v19 = vpop.permute.xlu0 %718 }
 0x464   : > { %v721_v20 = vadd.f32 %v719_v19, %v669_v1  ;;  %v807_v1 = vld [vmem:[#allocation3 + $0x18] sm:$0xff] }
 0x466   : > { %1624 = vtanh.f32 %v721_v20 }
 0x46c   : > { %v1625_v21 = vpop.eup %1624 }
 0x46d   : > { %725 = vrot.lane.b32.xlu1 %v1625_v21, %s1823_s21 }
 0x4df   : > { %v726_v24 = vpop.permute.xlu1 %725 }
 0x4e0   : > { %v728_v26 = vmul.f32 %v726_v24, %v723_v23 }
 0x4e2   : > { %v730_v27 = vadd.f32 %v729_v25, %v728_v26 }
 0x4e4   : > { %732 = vrot.lane.b32.xlu2 %v730_v27, %s1823_s21 }
 0x53e   : > { %v733_v28 = vpop.permute.xlu2 %732 }
 0x53f   : > { %736 = vst.msk [vmem:[#allocation2 + $0x8] sm:$0xff] %vm481_vm0, %v733_v28  ;;  %1498 = vmatmul.msk.f32.vlgmr.msra.gmra.mxu1 %vm481_vm0, %v733_v28  ;;  %v535_v28 = vpop.f32.mrf.mxu0 }
 0x540   : > { %v536_v29 = vadd.f32 %v2055_v17, %v535_v28 }
 0x542   : > { %552 = vst.msk [vmem:[#allocation3 + $0x20] sm:$0xff] %vm547_vm1, %v536_v29 }
 0x5bc   : > { %v758_v32 = vpop.f32.mrf.mxu1 }
 0x5bd   : > { %v759_v33 = vadd.f32 %v2076_v30, %v758_v32 }
 0x5bf   : > { %782 = vrot.lane.b32.xlu0 %v759_v33, %s1822_s18  ;;  %v761_v35 = vadd.f32 %v759_v33, %v738_v34 }
 0x5c1   : > { %v1499_v36 = vmul.f32 -1.442695, %v761_v35 }
 0x5c3   : > { %1626 = vpow2.f32 %v1499_v36 }
 0x5c9   : > { %v1627_v37 = vpop.eup %1626 }
 0x5ca   : > { %v765_v38 = vadd.f32 1.0, %v1627_v37 }
 0x5cc   : > { %1628 = vrcp.f32 %v765_v38  ;;  %v777_v44 = vand.u32 2147483648, %v765_v38  ;;  %vm771_vm11 = vweird.f32 %v765_v38  ;;  %v775_v45 = vand.u32 2147483647, %v765_v38 }
 0x5ce   : > { %v778_v47 = vor.u32 1.1754944e-38, %v777_v44  ;;  %vm776_vm13 = vcmp.eq.f32.partialorder %v775_v45, 8.507059e+37 }
 0x5d2   : > { %v1629_v39 = vpop.eup %1628 }
 0x5d3   : > { %v767_v40 = vmul.f32 %v1629_v39, %v765_v38  ;;  %vm772_vm10 = vweird.f32 %v1629_v39 }
 0x5d4   : > { %vm773_vm12 = vmor %vm771_vm11, %vm772_vm10 }
 0x5d5   : > { %v768_v41 = vsub.f32 1.0, %v767_v40 }
 0x5d7   : > { %v769_v42 = vmul.f32 %v1629_v39, %v768_v41 }
 0x5d9   : > { %v770_v43 = vadd.f32 %v1629_v39, %v769_v42 }
 0x5db   : > { %v774_v46 = vsel %vm773_vm12, %v1629_v39, %v770_v43 }
 0x5dc   : > { %v779_v49 = vsel %vm776_vm13, %v778_v47, %v774_v46 }
 0x5dd   : > { %v792_v55 = vsub.f32 1.0, %v779_v49  ;;  %v798_v57 = vmul.f32 %v779_v49, %v730_v27 }
 0x631   : > { %v783_v48 = vpop.permute.xlu0 %782 }
 0x632   : > { %v785_v50 = vmul.f32 %v783_v48, %v779_v49 }
 0x634   : > { %787 = vrot.lane.b32.xlu1 %v785_v50, %s1822_s18 }
 0x6a6   : > { %v788_v51 = vpop.permute.xlu1 %787 }
 0x6a7   : > { %v790_v52 = vadd.f32 %v788_v51, %v738_v34  ;;  %v876_v34 = vld [vmem:[#allocation3 + $0x20] sm:$0xff] }
 0x6a9   : > { %1630 = vtanh.f32 %v790_v52 }
 0x6af   : > { %v1631_v53 = vpop.eup %1630 }
 0x6b0   : > { %794 = vrot.lane.b32.xlu2 %v1631_v53, %s1823_s21 }
 0x70a   : > { %v795_v56 = vpop.permute.xlu2 %794 }
 0x70b   : > { %v797_v58 = vmul.f32 %v795_v56, %v792_v55 }
 0x70d   : > { %v799_v59 = vadd.f32 %v798_v57, %v797_v58 }
 0x70f   : > { %801 = vrot.lane.b32.xlu0 %v799_v59, %s1823_s21 }
 0x781   : > { %v802_v62 = vpop.permute.xlu0 %801 }
 0x782   : > { %805 = vst.msk [vmem:[#allocation2 + $0x10] sm:$0xff] %vm481_vm0, %v802_v62  ;;  %1500 = vmatmul.msk.f32.vlgmr.msra.gmra.mxu2 %vm481_vm0, %v802_v62 }
 0x805   : > { %v827_v63 = vpop.f32.mrf.mxu2 }
 0x806   : > { %v828_v0 = vadd.f32 %v2076_v30, %v827_v63 }
 0x808   : > { %851 = vrot.lane.b32.xlu1 %v828_v0, %s1822_s18  ;;  %v830_v2 = vadd.f32 %v828_v0, %v807_v1 }
 0x80a   : > { %v1501_v3 = vmul.f32 -1.442695, %v830_v2 }
 0x80c   : > { %1632 = vpow2.f32 %v1501_v3 }
 0x812   : > { %v1633_v4 = vpop.eup %1632 }
 0x813   : > { %v834_v5 = vadd.f32 1.0, %v1633_v4 }
 0x815   : > { %1634 = vrcp.f32 %v834_v5  ;;  %v846_v11 = vand.u32 2147483648, %v834_v5  ;;  %vm840_vm15 = vweird.f32 %v834_v5  ;;  %v844_v12 = vand.u32 2147483647, %v834_v5 }
 0x817   : > { %v847_v14 = vor.u32 1.1754944e-38, %v846_v11  ;;  %vm845_vm3 = vcmp.eq.f32.partialorder %v844_v12, 8.507059e+37 }
 0x81b   : > { %v1635_v6 = vpop.eup %1634 }
 0x81c   : > { %v836_v7 = vmul.f32 %v1635_v6, %v834_v5  ;;  %vm841_vm14 = vweird.f32 %v1635_v6 }
 0x81d   : > { %vm842_vm2 = vmor %vm840_vm15, %vm841_vm14 }
 0x81e   : > { %v837_v8 = vsub.f32 1.0, %v836_v7 }
 0x820   : > { %v838_v9 = vmul.f32 %v1635_v6, %v837_v8 }
 0x822   : > { %v839_v10 = vadd.f32 %v1635_v6, %v838_v9 }
 0x824   : > { %v843_v13 = vsel %vm842_vm2, %v1635_v6, %v839_v10 }
 0x825   : > { %v848_v16 = vsel %vm845_vm3, %v847_v14, %v843_v13 }
 0x826   : > { %v861_v23 = vsub.f32 1.0, %v848_v16  ;;  %v867_v25 = vmul.f32 %v848_v16, %v799_v59 }
 0x87a   : > { %v852_v15 = vpop.permute.xlu1 %851 }
 0x87b   : > { %v854_v18 = vmul.f32 %v852_v15, %v848_v16 }
 0x87d   : > { %856 = vrot.lane.b32.xlu2 %v854_v18, %s1822_s18 }
 0x8d7   : > { %v857_v19 = vpop.permute.xlu2 %856 }
 0x8d8   : > { %v859_v20 = vadd.f32 %v857_v19, %v807_v1 }
 0x8da   : > { %1636 = vtanh.f32 %v859_v20 }
 0x8e0   : > { %v1637_v21 = vpop.eup %1636 }
 0x8e1   : > { %863 = vrot.lane.b32.xlu0 %v1637_v21, %s1823_s21 }
 0x953   : > { %v864_v24 = vpop.permute.xlu0 %863 }
 0x954   : > { %v866_v26 = vmul.f32 %v864_v24, %v861_v23 }
 0x956   : > { %v868_v27 = vadd.f32 %v867_v25, %v866_v26  ;;  %v1014_v26 = vld [vmem:[#allocation3 + $0x30] sm:$0xff] }
 0x958   : > { %870 = vrot.lane.b32.xlu1 %v868_v27, %s1823_s21 }
 0x9ca   : > { %v871_v31 = vpop.permute.xlu1 %870 }
 0x9cb   : > { %874 = vst.msk [vmem:[#allocation2 + $0x18] sm:$0xff] %vm481_vm0, %v871_v31  ;;  %1502 = vmatmul.msk.f32.vlgmr.msrb.gmra.mxu3 %vm481_vm0, %v871_v31 }
 0xa4e   : > { %v896_v32 = vpop.f32.mrf.mxu3 }
 0xa4f   : > { %v897_v33 = vadd.f32 %v2076_v30, %v896_v32 }
 0xa51   : > { %920 = vrot.lane.b32.xlu2 %v897_v33, %s1822_s18  ;;  %v899_v35 = vadd.f32 %v897_v33, %v876_v34 }
 0xa53   : > { %v1503_v36 = vmul.f32 -1.442695, %v899_v35 }
 0xa55   : > { %1638 = vpow2.f32 %v1503_v36 }
 0xa5b   : > { %v1639_v37 = vpop.eup %1638 }
 0xa5c   : > { %v903_v38 = vadd.f32 1.0, %v1639_v37 }
 0xa5e   : > { %1640 = vrcp.f32 %v903_v38  ;;  %v915_v43 = vand.u32 2147483648, %v903_v38  ;;  %vm909_vm4 = vweird.f32 %v903_v38  ;;  %v913_v44 = vand.u32 2147483647, %v903_v38 }
 0xa60   : > { %v916_v46 = vor.u32 1.1754944e-38, %v915_v43  ;;  %vm914_vm6 = vcmp.eq.f32.partialorder %v913_v44, 8.507059e+37 }
 0xa64   : > { %v1641_v17 = vpop.eup %1640 }
 0xa65   : > { %v905_v39 = vmul.f32 %v1641_v17, %v903_v38  ;;  %vm910_vm1 = vweird.f32 %v1641_v17 }
 0xa66   : > { %vm911_vm5 = vmor %vm909_vm4, %vm910_vm1  ;;  %vm1151_vm4 = vcmask 0  }
 0xa67   : > { %v906_v40 = vsub.f32 1.0, %v905_v39 }
 0xa69   : > { %v907_v41 = vmul.f32 %v1641_v17, %v906_v40 }
 0xa6b   : > { %v908_v42 = vadd.f32 %v1641_v17, %v907_v41 }
 0xa6d   : > { %v912_v45 = vsel %vm911_vm5, %v1641_v17, %v908_v42 }
 0xa6e   : > { %v917_v48 = vsel %vm914_vm6, %v916_v46, %v912_v45 }
 0xa6f   : > { %v930_v53 = vsub.f32 1.0, %v917_v48  ;;  %v936_v55 = vmul.f32 %v917_v48, %v868_v27 }
 0xaab   : > { %v921_v47 = vpop.permute.xlu2 %920 }
 0xaac   : > { %v923_v49 = vmul.f32 %v921_v47, %v917_v48 }
 0xaae   : > { %925 = vrot.lane.b32.xlu0 %v923_v49, %s1822_s18 }
 0xb20   : > { %v926_v50 = vpop.permute.xlu0 %925 }
 0xb21   : > { %v928_v51 = vadd.f32 %v926_v50, %v876_v34 }
 0xb23   : > { %1642 = vtanh.f32 %v928_v51 }
 0xb29   : > { %v1643_v52 = vpop.eup %1642 }
 0xb2a   : > { %932 = vrot.lane.b32.xlu1 %v1643_v52, %s1823_s21 }
 0xb9c   : > { %v933_v54 = vpop.permute.xlu1 %932 }
 0xb9d   : > { %v935_v56 = vmul.f32 %v933_v54, %v930_v53  ;;  %v1083_v54 = vld [vmem:[#allocation3 + $0x38] sm:$0xff] }
 0xb9f   : > { %v937_v57 = vadd.f32 %v936_v55, %v935_v56 }
 0xba1   : > { %939 = vrot.lane.b32.xlu2 %v937_v57, %s1823_s21 }
 0xbfb   : > { %v940_v58 = vpop.permute.xlu2 %939 }
 0xbfc   : > { %943 = vst.msk [vmem:[#allocation2 + $0x20] sm:$0xff] %vm481_vm0, %v940_v58  ;;  %1504 = vmatmul.msk.f32.vlgmr.msrb.gmra.mxu1 %vm481_vm0, %v940_v58 }
 0xc79   : > { %v965_v59 = vpop.f32.mrf.mxu1 }
 0xc7a   : > { %v966_v60 = vadd.f32 %v2076_v30, %v965_v59 }
 0xc7c   : > { %989 = vrot.lane.b32.xlu0 %v966_v60, %s1822_s18  ;;  %v968_v62 = vadd.f32 %v966_v60, %v945_v61 }
 0xc7e   : > { %v1505_v63 = vmul.f32 -1.442695, %v968_v62 }
 0xc80   : > { %1644 = vpow2.f32 %v1505_v63 }
 0xc86   : > { %v1645_v0 = vpop.eup %1644 }
 0xc87   : > { %v972_v1 = vadd.f32 1.0, %v1645_v0 }
 0xc89   : > { %1646 = vrcp.f32 %v972_v1  ;;  %v984_v7 = vand.u32 2147483648, %v972_v1  ;;  %vm978_vm8 = vweird.f32 %v972_v1  ;;  %v982_v8 = vand.u32 2147483647, %v972_v1 }
 0xc8b   : > { %v985_v10 = vor.u32 1.1754944e-38, %v984_v7  ;;  %vm983_vm10 = vcmp.eq.f32.partialorder %v982_v8, 8.507059e+37 }
 0xc8f   : > { %v1647_v2 = vpop.eup %1646 }
 0xc90   : > { %v974_v3 = vmul.f32 %v1647_v2, %v972_v1  ;;  %vm979_vm7 = vweird.f32 %v1647_v2 }
 0xc91   : > { %vm980_vm9 = vmor %vm978_vm8, %vm979_vm7 }
 0xc92   : > { %v975_v4 = vsub.f32 1.0, %v974_v3 }
 0xc94   : > { %v976_v5 = vmul.f32 %v1647_v2, %v975_v4 }
 0xc96   : > { %v977_v6 = vadd.f32 %v1647_v2, %v976_v5 }
 0xc98   : > { %v981_v9 = vsel %vm980_vm9, %v1647_v2, %v977_v6 }
 0xc99   : > { %v986_v12 = vsel %vm983_vm10, %v985_v10, %v981_v9 }
 0xc9a   : > { %v999_v18 = vsub.f32 1.0, %v986_v12  ;;  %v1005_v20 = vmul.f32 %v986_v12, %v937_v57 }
 0xcee   : > { %v990_v11 = vpop.permute.xlu0 %989 }
 0xcef   : > { %v992_v13 = vmul.f32 %v990_v11, %v986_v12 }
 0xcf1   : > { %994 = vrot.lane.b32.xlu1 %v992_v13, %s1822_s18 }
 0xd63   : > { %v995_v14 = vpop.permute.xlu1 %994 }
 0xd64   : > { %v997_v15 = vadd.f32 %v995_v14, %v945_v61  ;;  %v1825_v14 = vmov 0.0  }
 0xd65   : > { %1152 = vst.msk [vmem:[#allocation8] sm:$0x1] %vm1151_vm4, %v1825_v14 }
 0xd66   : > { %1648 = vtanh.f32 %v997_v15 }
 0xd6c   : > { %v1649_v16 = vpop.eup %1648 }
 0xd6d   : > { %1001 = vrot.lane.b32.xlu2 %v1649_v16, %s1823_s21 }
 0xdc7   : > { %v1002_v19 = vpop.permute.xlu2 %1001 }
 0xdc8   : > { %v1004_v21 = vmul.f32 %v1002_v19, %v999_v18 }
 0xdca   : > { %v1006_v22 = vadd.f32 %v1005_v20, %v1004_v21 }
 0xdcc   : > { %1008 = vrot.lane.b32.xlu0 %v1006_v22, %s1823_s21 }
 0xe3e   : > { %v1009_v23 = vpop.permute.xlu0 %1008 }
 0xe3f   : > { %1012 = vst.msk [vmem:[#allocation2 + $0x28] sm:$0xff] %vm481_vm0, %v1009_v23  ;;  %1506 = vmatmul.msk.f32.vlgmr.msrb.gmra.mxu2 %vm481_vm0, %v1009_v23 }
 0xec2   : > { %v1034_v24 = vpop.f32.mrf.mxu2 }
 0xec3   : > { %v1035_v25 = vadd.f32 %v2076_v30, %v1034_v24 }
 0xec5   : > { %1058 = vrot.lane.b32.xlu1 %v1035_v25, %s1822_s18  ;;  %v1037_v27 = vadd.f32 %v1035_v25, %v1014_v26 }
 0xec7   : > { %v1507_v28 = vmul.f32 -1.442695, %v1037_v27 }
 0xec9   : > { %1650 = vpow2.f32 %v1507_v28 }
 0xecf   : > { %v1651_v29 = vpop.eup %1650 }
 0xed0   : > { %v1041_v31 = vadd.f32 1.0, %v1651_v29 }
 0xed2   : > { %1652 = vrcp.f32 %v1041_v31  ;;  %v1053_v37 = vand.u32 2147483648, %v1041_v31  ;;  %vm1047_vm12 = vweird.f32 %v1041_v31  ;;  %v1051_v38 = vand.u32 2147483647, %v1041_v31 }
 0xed4   : > { %v1054_v39 = vor.u32 1.1754944e-38, %v1053_v37  ;;  %vm1052_vm14 = vcmp.eq.f32.partialorder %v1051_v38, 8.507059e+37 }
 0xed8   : > { %v1653_v32 = vpop.eup %1652 }
 0xed9   : > { %v1043_v33 = vmul.f32 %v1653_v32, %v1041_v31  ;;  %vm1048_vm11 = vweird.f32 %v1653_v32 }
 0xeda   : > { %vm1049_vm13 = vmor %vm1047_vm12, %vm1048_vm11 }
 0xedb   : > { %v1044_v34 = vsub.f32 1.0, %v1043_v33 }
 0xedd   : > { %v1045_v35 = vmul.f32 %v1653_v32, %v1044_v34 }
 0xedf   : > { %v1046_v36 = vadd.f32 %v1653_v32, %v1045_v35 }
 0xee1   : > { %v1050_v17 = vsel %vm1049_vm13, %v1653_v32, %v1046_v36 }
 0xee2   : > { %v1055_v41 = vsel %vm1052_vm14, %v1054_v39, %v1050_v17 }
 0xee3   : > { %v1068_v46 = vsub.f32 1.0, %v1055_v41  ;;  %v1074_v48 = vmul.f32 %v1055_v41, %v1006_v22 }
 0xf37   : > { %v1059_v40 = vpop.permute.xlu1 %1058 }
 0xf38   : > { %v1061_v42 = vmul.f32 %v1059_v40, %v1055_v41 }
 0xf3a   : > { %1063 = vrot.lane.b32.xlu2 %v1061_v42, %s1822_s18 }
 0xf94   : > { %v1064_v43 = vpop.permute.xlu2 %1063 }
 0xf95   : > { %v1066_v44 = vadd.f32 %v1064_v43, %v1014_v26 }
 0xf97   : > { %1654 = vtanh.f32 %v1066_v44 }
 0xf9d   : > { %v1655_v45 = vpop.eup %1654 }
 0xf9e   : > { %1070 = vrot.lane.b32.xlu0 %v1655_v45, %s1823_s21 }
0x1010   : > { %v1071_v47 = vpop.permute.xlu0 %1070 }
0x1011   : > { %v1073_v49 = vmul.f32 %v1071_v47, %v1068_v46 }
0x1013   : > { %v1075_v50 = vadd.f32 %v1074_v48, %v1073_v49 }
0x1015   : > { %1077 = vrot.lane.b32.xlu1 %v1075_v50, %s1823_s21 }
0x1087   : > { %v1078_v51 = vpop.permute.xlu1 %1077 }
0x1088   : > { %1081 = vst.msk [vmem:[#allocation2 + $0x30] sm:$0xff] %vm481_vm0, %v1078_v51  ;;  %1508 = vmatmul.msk.f32.vlgmr.msra.gmra.mxu3 %vm481_vm0, %v1078_v51 }
0x110b   : > { %v1103_v52 = vpop.f32.mrf.mxu3 }
0x110c   : > { %v1104_v53 = vadd.f32 %v2076_v30, %v1103_v52 }
0x110e   : > { %1127 = vrot.lane.b32.xlu2 %v1104_v53, %s1822_s18  ;;  %v1106_v55 = vadd.f32 %v1104_v53, %v1083_v54 }
0x1110   : > { %v1509_v56 = vmul.f32 -1.442695, %v1106_v55 }
0x1112   : > { %1656 = vpow2.f32 %v1509_v56 }
0x1118   : > { %v1657_v57 = vpop.eup %1656 }
0x1119   : > { %v1110_v58 = vadd.f32 1.0, %v1657_v57 }
0x111b   : > { %1658 = vrcp.f32 %v1110_v58  ;;  %v1122_v0 = vand.u32 2147483648, %v1110_v58  ;;  %vm1116_vm2 = vweird.f32 %v1110_v58  ;;  %v1120_v1 = vand.u32 2147483647, %v1110_v58 }
0x111d   : > { %v1123_v2 = vor.u32 1.1754944e-38, %v1122_v0  ;;  %vm1121_vm1 = vcmp.eq.f32.partialorder %v1120_v1, 8.507059e+37 }
0x1121   : > { %v1659_v59 = vpop.eup %1658 }
0x1122   : > { %v1112_v60 = vmul.f32 %v1659_v59, %v1110_v58  ;;  %vm1117_vm15 = vweird.f32 %v1659_v59 }
0x1123   : > { %vm1118_vm3 = vmor %vm1116_vm2, %vm1117_vm15 }
0x1124   : > { %v1113_v61 = vsub.f32 1.0, %v1112_v60 }
0x1126   : > { %v1114_v62 = vmul.f32 %v1659_v59, %v1113_v61 }
0x1128   : > { %v1115_v63 = vadd.f32 %v1659_v59, %v1114_v62 }
0x112a   : > { %v1119_v30 = vsel %vm1118_vm3, %v1659_v59, %v1115_v63 }
0x112b   : > { %v1124_v4 = vsel %vm1121_vm1, %v1123_v2, %v1119_v30 }
0x112c   : > { %v1137_v9 = vsub.f32 1.0, %v1124_v4  ;;  %v1143_v11 = vmul.f32 %v1124_v4, %v1075_v50 }
0x1168   : > { %v1128_v3 = vpop.permute.xlu2 %1127 }
0x1169   : > { %v1130_v5 = vmul.f32 %v1128_v3, %v1124_v4 }
0x116b   : > { %1132 = vrot.lane.b32.xlu0 %v1130_v5, %s1822_s18 }
0x11dd   : > { %v1133_v6 = vpop.permute.xlu0 %1132 }
0x11de   : > { %v1135_v7 = vadd.f32 %v1133_v6, %v1083_v54 }
0x11e0   : > { %1660 = vtanh.f32 %v1135_v7 }
0x11e6   : > { %v1661_v8 = vpop.eup %1660 }
0x11e7   : > { %1139 = vrot.lane.b32.xlu1 %v1661_v8, %s1823_s21 }
0x1259   : > { %v1140_v10 = vpop.permute.xlu1 %1139 }
0x125a   : > { %v1142_v12 = vmul.f32 %v1140_v10, %v1137_v9 }
0x125c   : > { %v1144_v13 = vadd.f32 %v1143_v11, %v1142_v12 }
0x125e   : > { %1146 = vrot.lane.b32.xlu2 %v1144_v13, %s1823_s21 }
0x12b8   : > { %v1147_v15 = vpop.permute.xlu2 %1146 }
0x12b9   : > { %1150 = vst.msk [vmem:[#allocation2 + $0x38] sm:$0xff] %vm481_vm0, %v1147_v15 }
0x12ba PF: > { %v1162_v16 = vld [vmem:[%s2273_s9 + $0x18] sm:$0xff]  ;;  %v1161_v18 = vld [vmem:[%s2273_s9 + $0x10] sm:$0xff]  ;;  %s2168_s25 = sshll.u32 %s1926_s17, 5  ;;  %v1160_v19 = vld [vmem:[%s2273_s9 + $0x8] sm:$0xff]  ;;  %vm1167_vm0 = vcmask 261120   ;;  %s2296_s1 = sld [smem:[#allocation15_spill]]  ;;  %v1311_v9 = vlaneseq }
0x12bb   : > { %1192 = vmatpush.msra.mxu0 %v1162_v16  ;;  %1535 = vmatpush.msra.mxu2 %v1162_v16  ;;  %v1159_v20 = vld [vmem:[%s2273_s9] sm:$0xff]  ;;  %s1154_s18 = scalar_lea.vmem [#allocation2], %s2168_s25  ;;  %v1216_v25 = vld [vmem:[%s2275_s11 + $0x18] sm:$0xff]  ;;  %v1215_v26 = vld [vmem:[%s2275_s11 + $0x10] sm:$0xff]  ;;  %v1826_v43 = vmov 0   ;;  %vm1349_vm11 = vcmask 7168   ;;  %s1384_s28 = scalar_lea.hbm %s2277_s13, %s2168_s25 }
0x12bc   : > { %1245 = vmatpush.msra.mxu1 %v1216_v25  ;;  %1539 = vmatpush.msra.mxu3 %v1216_v25  ;;  %v1214_v27 = vld [vmem:[%s2275_s11 + $0x8] sm:$0xff]  ;;  %v1213_v28 = vld [vmem:[%s2275_s11] sm:$0xff]  ;;  %v1312_v11 = vand.u32 127, %v1311_v9  ;;  %s1387_s27 = sshll.u32 %s1384_s28, 4  ;;  %s1385_s20 = sshll.u32 %s1963_s22, 4  ;;  %s1388_s27 = int_to_ptr.hbm [resolvable:$true] %s1387_s27  ;;  %s1386_s20 = int_to_ptr.vmem [resolvable:$true] %s1385_s20 }
0x12bd   : > { %1193 = vmatpush.msra.mxu0 %v1161_v18  ;;  %1536 = vmatpush.msra.mxu2 %v1161_v18  ;;  %v1665_v29 = vld [vmem:[%s2274_s10] ss:$0 sm:$0xff]  ;;  %s1735_s2 = sshra.s32 %s1388_s27, 4  ;;  %s1741_s5 = scalar_lea.hbm %s2277_s13, 64  ;;  %s1736_s2 = int_to_ptr.hbm [resolvable:$true] %s1735_s2 }
0x12be   : > { %1246 = vmatpush.msra.mxu1 %v1215_v26  ;;  %1540 = vmatpush.msra.mxu3 %v1215_v26  ;;  %v1666_v44 = vld [vmem:[%s2276_s12] ss:$0 sm:$0xff]  ;;  %p1742_p4 = scmp.lt.s32.totalorder %s1736_s2, %s2277_s13 }
0x12bf   : > { %1194 = vmatpush.msra.mxu0 %v1160_v19  ;;  %1537 = vmatpush.msra.mxu2 %v1160_v19 }
0x12c0   : > { %v1155_v21 = vld [vmem:[%s1154_s18] sm:$0xff]  ;;  %v1157_v22 = vld [vmem:[%s1154_s18 + $0x10] sm:$0xff]  ;;  %v1156_v23 = vld [vmem:[%s1154_s18 + $0x8] sm:$0xff]  ;;  %1247 = vmatpush.msra.mxu1 %v1214_v27  ;;  %1541 = vmatpush.msra.mxu3 %v1214_v27  ;;  %s2204_s21 = scalar_lea.vmem %s2296_s1, %s2168_s25  ;;  %s1737_s1 = scalar_lea.hbm %s1736_s2, 32 }
0x12c1   : > { %1195 = vmatpush.msra.mxu0 %v1159_v20  ;;  %1538 = vmatpush.msra.mxu2 %v1159_v20  ;;  %v1158_v24 = vld [vmem:[%s1154_s18 + $0x18] sm:$0xff]  ;;  %v2207_v42 = vld [vmem:[%s2204_s21] sm:$0xff]  ;;  %v1308_v4 = vld [vmem:[%s2204_s21 + $0x8] sm:$0xff]  ;;  %p1738_p0 = scmp.ne.s32.totalorder %s1736_s2, %s1737_s1  ;;  %p1743_p7 = scmp.lt.s32.totalorder %s1741_s5, %s1737_s1 }
0x12c2   : > { %1511 = vmatmul.msk.f32.vlgmr.msra.gmra.mxu0 %vm1167_vm0, %v1155_v21  ;;  %1513 = vmatmul.msk.f32.vlgmr.msra.gmra.mxu2 %vm1167_vm0, %v1157_v22  ;;  %v1310_v5 = vld [vmem:[%s2204_s21 + $0x18] sm:$0xff]  ;;  %v1309_v6 = vld [vmem:[%s2204_s21 + $0x10] sm:$0xff]  ;;  %vm1342_vm9 = vcmp.ne.s32.totalorder %v1308_v4, 0  ;;  %vm1341_vm10 = vcmp.ne.s32.totalorder %v2207_v42, 0  ;;  %s2297_s21 = sand.u32 1, %s1811_s30  }
0x12c3   : > { %1248 = vmatpush.msra.mxu1 %v1213_v28  ;;  %1542 = vmatpush.msra.mxu3 %v1213_v28  ;;  %vm1344_vm12 = vcmp.ne.s32.totalorder %v1310_v5, 0  ;;  %vm1343_vm13 = vcmp.ne.s32.totalorder %v1309_v6, 0  ;;  %s1373_s26 = scalar_lea.sflag [#allocation6], %s2297_s21  ;;  %p1739_p1 = pnand %p1738_p0, %p1945_p5 }
0x12c4   : > { %1662 = vset.pattern.permute.xlu2 %v1826_v43  ;;  %1663 = vset.pattern.permute.xlu0 %v1826_v43  ;;  %p1744_p8 = por %p1743_p7, %p1742_p4 }
0x12c5   : > { %1314 = vperm.xlu2 %1662, %v2207_v42   ;;  %1664 = vset.pattern.permute.xlu1 %v1826_v43  ;;  %p1740_p3 = pneg %p1739_p1 }
0x12c7   : > { %p1745_p9 = pnand %p1744_p8, %p1740_p3 }
0x12ca   : > { %1512 = vmatmul.msk.f32.gmra.mxu0 %vm1167_vm0, %v1156_v23  ;;  %1514 = vmatmul.msk.f32.gmra.mxu2 %vm1167_vm0, %v1158_v24 }
0x131f   : > { %v1315_v7 = vpop.permute.xlu2 %1314 }
0x1320   : > { %vm1325_vm5 = vcmp.eq.s32.totalorder %v1312_v11, %v1315_v7 }
0x133f   : > { %v1197_v31 = vpop.f32.mrf.mxu0 }
0x1340   : > { %v1198_v32 = vadd.f32 %v1665_v29, %v1197_v31 }
0x1342   : > { %1667 = vtanh.f32 %v1198_v32 }
0x1345   : > { %v1203_v33 = vpop.f32.mrf.mxu2 }
0x1346   : > { %v1204_v34 = vadd.f32 %v1665_v29, %v1203_v33 }
0x1347   : > { %v1200_v35 = vpop.f32.mrf.mxu0 }
0x1348   : > { %v1668_v36 = vpop.eup %1667  ;;  %1669 = vtanh.f32 %v1204_v34  ;;  %v1201_v37 = vadd.f32 %v1665_v29, %v1200_v35 }
0x1349   : > { %1515 = vmatmul.msk.f32.vlgmr.msra.gmra.mxu1 %vm1167_vm0, %v1668_v36 }
0x134a   : > { %1671 = vtanh.f32 %v1201_v37 }
0x134d   : > { %v1206_v38 = vpop.f32.mrf.mxu2 }
0x134e   : > { %v1670_v17 = vpop.eup %1669  ;;  %v1207_v39 = vadd.f32 %v1665_v29, %v1206_v38 }
0x134f   : > { %1517 = vmatmul.msk.f32.vlgmr.msra.gmra.mxu3 %vm1167_vm0, %v1670_v17 }
0x1350   : > { %v1672_v40 = vpop.eup %1671  ;;  %1673 = vtanh.f32 %v1207_v39 }
0x1351   : > { %1516 = vmatmul.msk.f32.gmra.mxu1 %vm1167_vm0, %v1672_v40 }
0x1356   : > { %v1674_v41 = vpop.eup %1673 }
0x1357   : > { %1518 = vmatmul.msk.f32.gmra.mxu3 %vm1167_vm0, %v1674_v41 }
0x13c6   : > { %v1250_v45 = vpop.f32.mrf.mxu1 }
0x13c7   : > { %v1251_v46 = vadd.f32 %v1666_v44, %v1250_v45 }
0x13c9   : > { %1262 = vmax.xlane.f32.xlu0 %v1251_v46 }
0x13ce   : > { %v1253_v47 = vpop.f32.mrf.mxu1 }
0x13cf   : > { %v1254_v48 = vadd.f32 %v1666_v44, %v1253_v47 }
0x13d1   : > { %1264 = vmax.xlane.f32.xlu0 %v1254_v48 }
0x13d2   : > { %v1256_v49 = vpop.f32.mrf.mxu3 }
0x13d3   : > { %v1257_v50 = vadd.f32 %v1666_v44, %v1256_v49 }
0x13d5   : > { %1266 = vmax.xlane.f32.xlu1 %v1257_v50 }
0x13da   : > { %v1259_v51 = vpop.f32.mrf.mxu3 }
0x13db   : > { %v1260_v52 = vadd.f32 %v1666_v44, %v1259_v51 }
0x13dd   : > { %1268 = vmax.xlane.f32.xlu1 %v1260_v52 }
0x143c   : > { %v1263_v53 = vpop.xlane.xlu0 %1262 }
0x143d   : > { %v1270_v54 = vsub.f32 %v1251_v46, %v1263_v53 }
0x143f   : > { %v1274_v55 = vmul.f32 1.442695, %v1270_v54 }
0x1441   : > { %1675 = vpow2.f32 %v1274_v55 }
0x1444   : > { %v1265_v56 = vpop.xlane.xlu0 %1264 }
0x1445   : > { %v1271_v57 = vsub.f32 %v1254_v48, %v1265_v56 }
0x1447   : > { %v1676_v58 = vpop.eup %1675  ;;  %v1276_v59 = vmul.f32 1.442695, %v1271_v57 }
0x1448   : > { %v1267_v60 = vpop.xlane.xlu1 %1266  ;;  %1282 = vadd.xlane.f32.xlu2 %v1676_v58 }
0x1449   : > { %1677 = vpow2.f32 %v1276_v59  ;;  %v1272_v61 = vsub.f32 %v1257_v50, %v1267_v60 }
0x144b   : > { %v1278_v62 = vmul.f32 1.442695, %v1272_v61 }
0x144d   : > { %1679 = vpow2.f32 %v1278_v62 }
0x144f   : > { %v1678_v63 = vpop.eup %1677 }
0x1450   : > { %v1269_v0 = vpop.xlane.xlu1 %1268  ;;  %1284 = vadd.xlane.f32.xlu2 %v1678_v63 }
0x1451   : > { %v1273_v1 = vsub.f32 %v1260_v52, %v1269_v0 }
0x1453   : > { %v1680_v30 = vpop.eup %1679  ;;  %v1280_v2 = vmul.f32 1.442695, %v1273_v1 }
0x1454   : > { %1286 = vadd.xlane.f32.xlu0 %v1680_v30 }
0x1455   : > { %1681 = vpow2.f32 %v1280_v2 }
0x145b   : > { %v1682_v3 = vpop.eup %1681 }
0x145c   : > { %1288 = vadd.xlane.f32.xlu1 %v1682_v3 }
0x1468   : > { %1317 = vperm.xlu0 %1663, %v1308_v4   ;;  %1323 = vperm.xlu2 %1662, %v1310_v5  }
0x1475   : > { %1320 = vperm.xlu1 %1664, %v1309_v6  }
0x14bb   : > { %v1283_v8 = vpop.xlane.xlu2 %1282 }
0x14bc   : > { %1683 = vlog2.f32 %v1283_v8 }
0x14c2   : > { %v1684_v10 = vpop.eup %1683 }
0x14c3   : > { %v1291_v12 = vmul.f32 0.6931472, %v1684_v10  ;;  %v1285_v13 = vpop.xlane.xlu2 %1284 }
0x14c4   : > { %1685 = vlog2.f32 %v1285_v13 }
0x14c5   : > { %v1298_v14 = vsub.f32 %v1270_v54, %v1291_v12 }
0x14c7   : > { %v1287_v15 = vpop.xlane.xlu0 %1286  ;;  %1302 = vst [vmem:[%s1963_s22] sm:$0xff] %v1298_v14  ;;  %v1329_v16 = vsel %vm1325_vm5, %v1298_v14, 0.0 }
0x14c8   : > { %1687 = vlog2.f32 %v1287_v15  ;;  %1333 = vadd.xlane.f32.xlu2 %v1329_v16 }
0x14ca   : > { %v1686_v18 = vpop.eup %1685 }
0x14cb   : > { %v1293_v19 = vmul.f32 0.6931472, %v1686_v18  ;;  %v1324_v26 = vpop.permute.xlu2 %1323 }
0x14cc   : > { %vm1328_vm6 = vcmp.eq.s32.totalorder %v1312_v11, %v1324_v26 }
0x14cd   : > { %v1299_v20 = vsub.f32 %v1271_v57, %v1293_v19 }
0x14ce   : > { %v1688_v21 = vpop.eup %1687 }
0x14cf   : > { %v1295_v22 = vmul.f32 0.6931472, %v1688_v21  ;;  %v1289_v23 = vpop.xlane.xlu1 %1288  ;;  %1303 = vst [vmem:[%s1963_s22 + $0x8] sm:$0xff] %v1299_v20 }
0x14d0   : > { %1689 = vlog2.f32 %v1289_v23 }
0x14d1   : > { %v1300_v24 = vsub.f32 %v1272_v61, %v1295_v22 }
0x14d3   : > { %1304 = vst [vmem:[%s1963_s22 + $0x10] sm:$0xff] %v1300_v24 }
0x14d6   : > { %v1690_v25 = vpop.eup %1689 }
0x14d7   : > { %v1297_v27 = vmul.f32 0.6931472, %v1690_v25 }
0x14d9   : > { %v1301_v28 = vsub.f32 %v1273_v1, %v1297_v27 }
0x14da   : > { %v1318_v29 = vpop.permute.xlu0 %1317 }
0x14db   : > { %vm1326_vm7 = vcmp.eq.s32.totalorder %v1312_v11, %v1318_v29  ;;  %1305 = vst [vmem:[%s1963_s22 + $0x18] sm:$0xff] %v1301_v28  ;;  %v1332_v31 = vsel %vm1328_vm6, %v1301_v28, 0.0 }
0x14dc   : > { %1339 = vadd.xlane.f32.xlu2 %v1332_v31  ;;  %v1330_v32 = vsel %vm1326_vm7, %v1299_v20, 0.0 }
0x14dd   : > { %1335 = vadd.xlane.f32.xlu1 %v1330_v32 }
0x14e7   : > { %v1321_v33 = vpop.permute.xlu1 %1320 }
0x14e8   : > { %vm1327_vm8 = vcmp.eq.s32.totalorder %v1312_v11, %v1321_v33 }
0x14e9   : > { %v1331_v34 = vsel %vm1327_vm8, %v1300_v24, 0.0 }
0x14ea   : > { %1337 = vadd.xlane.f32.xlu0 %v1331_v34 }
0x153b   : > { %v1334_v35 = vpop.xlane.xlu2 %1333 }
0x153c   : > { %v1345_v38 = vsel %vm1341_vm10, %v1334_v35, 0.0 }
0x153d   : > { %v1350_v40 = vsel %vm1349_vm11, %v1345_v38, 0.0 }
0x154f   : > { %v1340_v17 = vpop.xlane.xlu2 %1339 }
0x1550   : > { %v1336_v36 = vpop.xlane.xlu1 %1335  ;;  %v1348_v43 = vsel %vm1344_vm12, %v1340_v17, 0.0 }
0x1551   : > { %v1346_v37 = vsel %vm1342_vm9, %v1336_v36, 0.0  ;;  %v1355_v48 = vsel %vm1349_vm11, %v1348_v43, 0.0 }
0x1552   : > { %v1351_v39 = vsel %vm1349_vm11, %v1346_v37, 0.0 }
0x1553   : > { %v1352_v44 = vadd.f32 %v1351_v39, %v1350_v40 }
0x155d   : > { %v1338_v41 = vpop.xlane.xlu0 %1337 }
0x155e   : > { %v1347_v45 = vsel %vm1343_vm13, %v1338_v41, 0.0 }
0x155f   : > { %v1353_v46 = vsel %vm1349_vm11, %v1347_v45, 0.0 }
0x1560   : > { %v1354_v47 = vadd.f32 %v1353_v46, %v1352_v44 }
0x1562   : > { %v1356_v42 = vadd.f32 %v1355_v48, %v1354_v47 }
0x1564   : > { %1357 = vadd.xlane.f32.xlu1 %v1356_v42 }
0x1565   : > { %1748 = shalt.err (!%p1745_p9)
}
0x1566   : > { %s1827_s22 = smov 128   ;;  %s1828_s25 = smov 8   ;;  %v1367_v56 = vld [vmem:[#allocation8] sm:$0x1]  ;;  %vm1370_vm14 = vcmask 0  }
0x1567   : > { %1549 = dma.vmem_to_hbm [thread:$0]  (%p1945_p5), %s1386_s20, 512, %s1388_s27, %s1373_s26, %s1827_s22, %s1827_s22, %s1828_s25  }
0x1568   : > { %s1829_s1 = smov [#allocation8]   ;;  %s1402_s23 = sshll.u32 %s2278_s14, 4  ;;  %s1403_s23 = int_to_ptr.hbm [resolvable:$true] %s1402_s23 }
0x1569   : > { %s1400_s4 = sshll.u32 %s1829_s1, 4  ;;  %s1401_s4 = int_to_ptr.vmem [resolvable:$true] %s1400_s4 }
0x15d7   : > { %v1358_v49 = vpop.xlane.xlu1 %1357 }
0x15d8   : > { %v1359_v50 = vrot.slane %v1358_v49, 4 }
0x15da   : > { %v1360_v51 = vadd.f32 %v1359_v50, %v1358_v49 }
0x15dc   : > { %v1361_v52 = vrot.slane %v1360_v51, 2 }
0x15de   : > { %v1362_v53 = vadd.f32 %v1361_v52, %v1360_v51 }
0x15e0   : > { %v1363_v54 = vrot.slane %v1362_v53, 1 }
0x15e2   : > { %v1364_v55 = vadd.f32 %v1363_v54, %v1362_v53 }
0x15e4   : > { %1543 = vpush %v1364_v55 }
0x1615   : > { %s1544_s3 = spop %1543 }
0x1616   : > { %s1366_s5 = ssub.f32 0.0, %s1544_s3 }
0x1618   : > { %v1368_v57 = vstv %s1366_s5 }
0x1619   : > { %v1369_v58 = vadd.f32 %v1368_v57, %v1367_v56 }
0x161b   : > { %1371 = vst.msk [vmem:[#allocation8] sm:$0x1] %vm1370_vm14, %v1369_v58 }
0x161c   : > { %1551 = dma.vmem_to_hbm [thread:$0]  (%p321_p2), %s1401_s4, 16, %s1403_s23, [#allocation9]  }
0x161d   : > { %1798 = dma.done.wait (%p321_p2), [#allocation9], 16  }
0x161e   : > { %1800 = vsyncadd (%p321_p2), [#allocation9], 4294967280 }
0x161f PF: > { %p1567_p5 = scmp.ge.s32.totalorder %s1819_s16, 2  ;;  %s1419_s28 = sand.u32 1, %s1807_s29  }
0x1620   : > { %s1420_s27 = scalar_lea.sflag [#allocation6], %s1419_s28 }
0x1621   : > { %p1560_p10 = pnand %p1567_p5, %p1949_p6 }
0x1623   : > { %p1561_p11 = pneg %p1560_p10 }
0x1625   : > { %1802 = dma.done.wait (%p1561_p11), %s1420_s27, 512  }
0x1626   : > { %1804 = vsyncadd (%p1561_p11), %s1420_s27, 4294966784  ;;  %s2298_s20 = sld [smem:[#allocation13_spill]]  ;;  %p27_p12 = scmp.ge.s32.totalorder %s1930_s19, 4  }
0x1627   : > { %s2299_s29 = smov %s1811_s30  ;;  %s2300_s30 = smov %s1815_s15 }
0x1628   : > { %s2302_s16 = smov %s1930_s19  ;;  %29 = sbr.rel (!%p27_p12) target bundleno = 13 (0xd), region = 137 }
0x162c   : > { %s2301_s15 = smov %s2298_s20 }
0x162d   :  { %1426 = vsyncpa [#allocation5], 1 }
0x162e   :  { %1428 = vsyncpa [#allocation5 + $0x1], 1 }
0x162f   :  { %1429 = vsyncpa [#allocation6], 1 }
0x1630   :  { %1431 = vsyncpa [#allocation6 + $0x1], 1 }
0x1631   :  { %1432 = vsyncpa [#allocation9], 1 }

</bundles_post_ra>
